<compile_context>
chip_gen: v7x
topology: tpu7x:2x2x1
jax: 0.10.0
libtpu: 0.0.40
codegen_flags: <defaults>
</compile_context>

<pallas_src>
import math
import functools

import numpy as np
import jax
import jax.numpy as jnp
from jax import lax
from jax.experimental import pallas as pl
from jax.experimental.pallas import tpu as pltpu


# ----------------------------------------------------------------------------
# Tile selection helpers
# ----------------------------------------------------------------------------

def _pick_tile(dim, pref, align):
    """Largest aligned divisor of `dim` that is <= pref; full extent if dim <= pref
    (always legal) or if no aligned divisor exists."""
    if dim <= pref:
        return dim
    start = (pref // align) * align
    for t in range(start, 0, -align):
        if dim % t == 0:
            return t
    return dim  # rare fallback: whole dimension as one block


def _pick_seq_tile(seq_len, cap=256):
    """Position-block size for the attention kernel (cap keeps v7x VMEM happy)."""
    if seq_len <= cap:
        return seq_len
    for t in range(cap, 0, -1):
        if seq_len % t == 0 and t % 8 == 0:
            return t
    return seq_len


# ----------------------------------------------------------------------------
# Tiled GEMM + bias kernel (bf16 operands, f32 accumulation)
# ----------------------------------------------------------------------------

def _matmul_bias_kernel(x_ref, w_ref, b_ref, o_ref, acc_ref):
    @pl.when(pl.program_id(2) == 0)
    def _init():
        acc_ref[...] = jnp.zeros_like(acc_ref)

    acc_ref[...] += jnp.dot(x_ref[...], w_ref[...],
                            preferred_element_type=jnp.float32)

    @pl.when(pl.program_id(2) == pl.num_programs(2) - 1)
    def _finish():
        o_ref[...] = (acc_ref[...] + b_ref[...].astype(jnp.float32)).astype(o_ref.dtype)


def pallas_linear(x, w, b, *, out_dtype=jnp.float32, tm=256, tn=512, tk=1024):
    """y = x @ w + b.   x: (M, K) bf16, w: (K, F) bf16, b: (F,) f32 -> (M, F) out_dtype."""
    M, K = x.shape
    K2, F = w.shape
    assert K == K2
    tm = _pick_tile(M, tm, 8)
    tn = _pick_tile(F, tn, 128)
    tk = _pick_tile(K, tk, 128)
    b2 = b.reshape(1, F).astype(jnp.float32)
    return pl.pallas_call(
        _matmul_bias_kernel,
        out_shape=jax.ShapeDtypeStruct((M, F), out_dtype),
        grid=(M // tm, F // tn, K // tk),
        in_specs=[
            pl.BlockSpec((tm, tk), lambda i, j, k: (i, k)),
            pl.BlockSpec((tk, tn), lambda i, j, k: (k, j)),
            pl.BlockSpec((1, tn), lambda i, j, k: (0, j)),
        ],
        out_specs=pl.BlockSpec((tm, tn), lambda i, j, k: (i, j)),
        scratch_shapes=[pltpu.VMEM((tm, tn), jnp.float32)],
        compiler_params=pltpu.CompilerParams(
            dimension_semantics=("parallel", "parallel", "arbitrary"),
            vmem_limit_bytes=32 * 1024 * 1024),
    )(x, w, b2)


# ----------------------------------------------------------------------------
# DERF attention kernel: attention over the H heads at each position.
#   Input : fused qkv block (1, T, 3, H, dk) bf16  (B_rf / scale already folded in)
#           feature bias    (1, dk) f32            (0.5*sum(omega^2) + D)
#   Output: context written pre-scrambled as (1, H, T, dk) bf16
# ----------------------------------------------------------------------------

def _derf_attn_kernel(qkv_ref, cb_ref, o_ref):
    qkv = qkv_ref[0]                                   # (T, 3, H, dk) bf16
    H = qkv.shape[2]
    c = cb_ref[...].astype(jnp.float32)                # (1, dk)

    q = qkv[:, 0].astype(jnp.float32) + c              # (T, H, dk) f32
    k = qkv[:, 1].astype(jnp.float32) + c
    v = qkv[:, 2].astype(jnp.float32)

    # Random-feature map: exp(arg).  Per-(position, head) max subtraction is exactly
    # cancelled by the L2 normalization and guards against f32 overflow at large dk.
    qf = jnp.exp(q - jnp.max(q, axis=-1, keepdims=True))
    kf = jnp.exp(k - jnp.max(k, axis=-1, keepdims=True))
    qf = qf * lax.rsqrt(jnp.sum(qf * qf, axis=-1, keepdims=True))   # EUP rsqrt
    kf = kf * lax.rsqrt(jnp.sum(kf * kf, axis=-1, keepdims=True))

    # Attention across heads at each position, one output head at a time (unrolled,
    # H is small).  Everything is VPU multiply + XLU reduce: the H x dk shapes are
    # far too small to feed the MXU efficiently.  Scores are in [0, 1] (dot of two
    # positive unit vectors), so no max-subtraction is needed before the softmax exp.
    for h in range(H):
        s_h = jnp.sum(qf[:, h:h + 1, :] * kf, axis=-1)               # (T, H)
        p_h = jnp.exp(s_h)
        p_h = p_h * pl.reciprocal(jnp.sum(p_h, axis=-1, keepdims=True), approx=True)
        ctx_h = jnp.sum(p_h[:, :, None] * v, axis=1)                 # (T, dk)
        # Write directly in the (B, H, S, dk) "scrambled" layout.
        o_ref[0, h] = ctx_h.astype(o_ref.dtype)


def pallas_derf_attention(qkv5, c_bias):
    """qkv5: (B, S, 3, H, dk) bf16, c_bias: (1, dk) f32 -> (B, H, S, dk) bf16."""
    B, S, three, H, dk = qkv5.shape
    assert three == 3
    T = _pick_seq_tile(S)
    return pl.pallas_call(
        _derf_attn_kernel,
        out_shape=jax.ShapeDtypeStruct((B, H, S, dk), jnp.bfloat16),
        grid=(B, S // T),
        in_specs=[
            pl.BlockSpec((1, T, 3, H, dk), lambda b, sb: (b, sb, 0, 0, 0)),
            pl.BlockSpec((1, dk), lambda b, sb: (0, 0)),
        ],
        out_specs=pl.BlockSpec((1, H, T, dk), lambda b, sb: (b, 0, sb, 0)),
        compiler_params=pltpu.CompilerParams(
            dimension_semantics=("parallel", "parallel"),
            vmem_limit_bytes=32 * 1024 * 1024),
    )(qkv5, c_bias)


# ----------------------------------------------------------------------------
# CustomBertSelfAttention forward
# ----------------------------------------------------------------------------

def custom_bert_self_attention(hidden_states, params, *, num_heads):
    """Mirrors CustomBertSelfAttention.forward -> (attention_output, None)."""
    B, S, E = hidden_states.shape
    H = num_heads
    dk = E // H
    N = B * S

    x = hidden_states.reshape(N, E).astype(jnp.bfloat16)

    # Fused Q/K/V projection (B_rf and 1/sqrt(dk) folded into the Q, K weights).
    qkv = pallas_linear(x, params["wqkv"], params["bqkv"],
                        out_dtype=jnp.bfloat16)                      # (N, 3E) bf16
    qkv5 = qkv.reshape(B, S, 3, H, dk)                               # free reshape

    # DERF attention; output already in (B, H, S, dk) layout and bf16.
    ctx = pallas_derf_attention(qkv5, params["c_bias"])

    # torch: context.transpose(1, 2).contiguous().view(B, S, E).
    # The kernel wrote the transposed layout already, so this is a free reshape.
    ctx2 = ctx.reshape(N, E)

    out = pallas_linear(ctx2, params["wo"], params["bo"],
                        out_dtype=jnp.float32)                       # (N, E) f32
    return out.reshape(B, S, E), None


# ----------------------------------------------------------------------------
# Parameter setup (plain JAX / numpy, done once)
# ----------------------------------------------------------------------------

def init_derf_params(key, embed_dim, num_heads):
    H = num_heads
    dk = embed_dim // H
    M = dk  # num_random_features == d_k (see fidelity notes)
    ks = jax.random.split(key, 7)

    def linear_init(k, fan_in, fan_out):
        kw, kb = jax.random.split(k)
        bound = 1.0 / math.sqrt(fan_in)
        w = jax.random.uniform(kw, (fan_in, fan_out), jnp.float32, -bound, bound)
        b = jax.random.uniform(kb, (fan_out,), jnp.float32, -bound, bound)
        return w, b

    wq, bq = linear_init(ks[0], embed_dim, embed_dim)
    wk, bk = linear_init(ks[1], embed_dim, embed_dim)
    wv, bv = linear_init(ks[2], embed_dim, embed_dim)
    wo, bo = linear_init(ks[3], embed_dim, embed_dim)

    # SymmetricRandomFeatures parameters (deterministic synthetic values).
    R = jax.random.normal(ks[4], (dk, M), jnp.float32)
    _, eigvecs = np.linalg.eigh(np.asarray(R @ R.T))
    random_matrix = jnp.asarray(eigvecs, jnp.float32)                # (dk, dk)
    # TODO(synk): reference overwrites B/D via torch.linalg.svd every forward; that
    #             path is un-runnable with 4-D q/k -> fixed parameters here.
    B_rf = 0.1 * jax.random.normal(ks[5], (dk, dk), jnp.float32)
    D = jnp.float32(1.0)
    # TODO(synk): omega is redrawn with torch.randn every forward in the reference;
    #             one deterministic draw is used instead.
    G = jax.random.normal(ks[6], (M, dk), jnp.float32)
    omega = random_matrix @ G.T                                      # (dk, M)
    c_bias = 0.5 * jnp.sum(omega ** 2, axis=0) + D                   # (M,) == (dk,)

    raw = {"wq": wq, "bq": bq, "wk": wk, "bk": bk, "wv": wv, "bv": bv,
           "wo": wo, "bo": bo, "brf": B_rf, "c_bias": c_bias}

    # Fold scale (1/sqrt(dk)) and per-head B_rf.T into the Q/K projections:
    #   (x@Wq+b)/sqrt(dk) @ B.T  ==  x @ Wq' + b'
    # c_bias is kept OUT of the bf16 intermediate and added in f32 in the kernel.
    scale = 1.0 / math.sqrt(dk)
    brf_t = B_rf.T                                                   # (dk, dk)

    def fold(w, b):
        wf = jnp.einsum('ehd,df->ehf', (w * scale).reshape(embed_dim, H, dk), brf_t)
        bf = jnp.einsum('hd,df->hf', (b * scale).reshape(H, dk), brf_t)
        return wf.reshape(embed_dim, embed_dim), bf.reshape(embed_dim)

    wq_f, bq_f = fold(wq, bq)
    wk_f, bk_f = fold(wk, bk)

    params = {
        "wqkv": jnp.concatenate([wq_f, wk_f, wv], axis=1).astype(jnp.bfloat16),
        "bqkv": jnp.concatenate([bq_f, bk_f, bv], axis=0),            # (3E,) f32
        "wo": wo.astype(jnp.bfloat16),
        "bo": bo,                                                      # (E,) f32
        "c_bias": c_bias.reshape(1, dk),                               # (1, dk) f32
    }
    return params, raw


def reference_forward(x, raw, num_heads):
    """Pure-JAX f32 mirror of DERFAttention.forward (for correctness checking)."""
    B, S, E = x.shape
    H = num_heads
    dk = E // H
    scale = 1.0 / math.sqrt(dk)
    x2 = x.reshape(B * S, E)
    q = ((x2 @ raw["wq"] + raw["bq"]) * scale).reshape(B, S, H, dk)
    k = ((x2 @ raw["wk"] + raw["bk"]) * scale).reshape(B, S, H, dk)
    v = (x2 @ raw["wv"] + raw["bv"]).reshape(B, S, H, dk)
    qf = jnp.exp(jnp.matmul(q, raw["brf"].T) + raw["c_bias"])
    kf = jnp.exp(jnp.matmul(k, raw["brf"].T) + raw["c_bias"])
    qf = qf / jnp.linalg.norm(qf, axis=-1, keepdims=True)
    kf = kf / jnp.linalg.norm(kf, axis=-1, keepdims=True)
    s = jnp.matmul(qf, jnp.swapaxes(kf, -1, -2))                     # (B, S, H, H)
    p = jax.nn.softmax(s, axis=-1)
    ctx = jnp.matmul(p, v)                                           # (B, S, H, dk)
    ctx = jnp.transpose(ctx, (0, 2, 1, 3)).reshape(B, S, E)
    out = ctx.reshape(B * S, E) @ raw["wo"] + raw["bo"]
    return out.reshape(B, S, E)


if __name__ == "__main__":
    # config: hidden_size=32, num_attention_heads=4 (d_k=8), seq=8, batch=2
    B, S, E, H = 2, 8, 32, 4

    key = jax.random.PRNGKey(0)
    kx, kp = jax.random.split(key)
    hidden_states = jax.random.normal(kx, (B, S, E), jnp.float32)
    params, raw = init_derf_params(kp, E, H)

    fwd = jax.jit(functools.partial(custom_bert_self_attention, num_heads=H))
    out, attn_probs = fwd(hidden_states, params)
    out = jax.block_until_ready(out)

    assert out.shape == (B, S, E), out.shape
    assert attn_probs is None
    assert bool(jnp.all(jnp.isfinite(out)))

    # Correctness check against a pure-JAX f32 reference (bf16 pipeline -> loose tol).
    ref = reference_forward(hidden_states, raw, H)
    max_err = float(jnp.max(jnp.abs(out - ref)))
    assert bool(jnp.allclose(out, ref, rtol=5e-2, atol=5e-2)), f"max abs err {max_err}"

    print("KERNEL_OK")
</pallas_src>

<mosaic_0001>
module attributes {stable_mosaic.version = 11 : i64} {
  func.func @_matmul_bias_kernel(%arg0: i32, %arg1: i32, %arg2: i32, %arg3: memref<16x32xbf16, #tpu.memory_space<vmem>>, %arg4: memref<32x96xbf16, #tpu.memory_space<vmem>>, %arg5: memref<1x96xf32, #tpu.memory_space<vmem>>, %arg6: memref<16x96xbf16, #tpu.memory_space<vmem>>, %arg7: memref<16x96xf32, #tpu.memory_space<vmem>>) attributes {dimension_semantics = [#tpu.dimension_semantics<parallel>, #tpu.dimension_semantics<parallel>, #tpu.dimension_semantics<arbitrary>], iteration_bounds = array<i64: 1, 1, 1>, scalar_prefetch = 0 : i64, scratch_operands = 1 : i64, tpu.core_type = #tpu.core_type<tc>, window_params = [{transform_indices = @transform_0, window_bounds = array<i64: 16, 32>}, {transform_indices = @transform_1, window_bounds = array<i64: 32, 96>}, {transform_indices = @transform_2, window_bounds = array<i64: 1, 96>}, {transform_indices = @transform_3, window_bounds = array<i64: 16, 96>}]} {
    %c0_i32 = arith.constant 0 : i32
    %0 = arith.cmpi eq, %arg2, %c0_i32 : i32
    %1 = arith.extui %0 : i1 to i32
    %c0_i32_0 = arith.constant 0 : i32
    %2 = arith.cmpi ne, %1, %c0_i32_0 : i32
    scf.if %2 {
      %cst_10 = arith.constant 0.000000e+00 : f32
      %12 = vector.broadcast %cst_10 : f32 to vector<16x96xf32>
      %c0_11 = arith.constant 0 : index
      %c0_12 = arith.constant 0 : index
      %13 = vector.load %arg7[%c0_11, %c0_12] : memref<16x96xf32, #tpu.memory_space<vmem>>, vector<16x96xf32>
      tpu.vector_store %arg7[%c0_11, %c0_12], %12 {strides = array<i32>} : memref<16x96xf32, #tpu.memory_space<vmem>>, vector<16x96xf32>,
    } else {
    }
    %c0 = arith.constant 0 : index
    %c0_1 = arith.constant 0 : index
    %3 = vector.load %arg7[%c0, %c0_1] : memref<16x96xf32, #tpu.memory_space<vmem>>, vector<16x96xf32>
    %c0_2 = arith.constant 0 : index
    %c0_3 = arith.constant 0 : index
    %4 = vector.load %arg3[%c0_2, %c0_3] : memref<16x32xbf16, #tpu.memory_space<vmem>>, vector<16x32xbf16>
    %c0_4 = arith.constant 0 : index
    %c0_5 = arith.constant 0 : index
    %5 = vector.load %arg4[%c0_4, %c0_5] : memref<32x96xbf16, #tpu.memory_space<vmem>>, vector<32x96xbf16>
    %cst = arith.constant dense<0.000000e+00> : vector<16x96xf32>
    %6 = tpu.matmul %4, %5, %cst {dimension_numbers = #tpu.dot_dimension_numbers<[1], [0], [0], [1], [0, 0, 1, 1], [], []>} : vector<16x32xbf16>, vector<32x96xbf16>, vector<16x96xf32> -> vector<16x96xf32>
    %7 = arith.addf %3, %6 : vector<16x96xf32>
    %c0_6 = arith.constant 0 : index
    %c0_7 = arith.constant 0 : index
    %8 = vector.load %arg7[%c0_6, %c0_7] : memref<16x96xf32, #tpu.memory_space<vmem>>, vector<16x96xf32>
    tpu.vector_store %arg7[%c0_6, %c0_7], %7 {strides = array<i32>} : memref<16x96xf32, #tpu.memory_space<vmem>>, vector<16x96xf32>,
    %c0_i32_8 = arith.constant 0 : i32
    %9 = arith.cmpi eq, %arg2, %c0_i32_8 : i32
    %10 = arith.extui %9 : i1 to i32
    %c0_i32_9 = arith.constant 0 : i32
    %11 = arith.cmpi ne, %10, %c0_i32_9 : i32
    scf.if %11 {
      %c0_10 = arith.constant 0 : index
      %c0_11 = arith.constant 0 : index
      %12 = vector.load %arg7[%c0_10, %c0_11] : memref<16x96xf32, #tpu.memory_space<vmem>>, vector<16x96xf32>
      %c0_12 = arith.constant 0 : index
      %c0_13 = arith.constant 0 : index
      %13 = vector.load %arg5[%c0_12, %c0_13] : memref<1x96xf32, #tpu.memory_space<vmem>>, vector<1x96xf32>
      %14 = vector.broadcast %13 : vector<1x96xf32> to vector<16x96xf32>
      %15 = arith.addf %12, %14 : vector<16x96xf32>
      %16 = arith.truncf %15 : vector<16x96xf32> to vector<16x96xbf16>
      %c0_14 = arith.constant 0 : index
      %c0_15 = arith.constant 0 : index
      %17 = vector.load %arg6[%c0_14, %c0_15] : memref<16x96xbf16, #tpu.memory_space<vmem>>, vector<16x96xbf16>
      tpu.vector_store %arg6[%c0_14, %c0_15], %16 {strides = array<i32>} : memref<16x96xbf16, #tpu.memory_space<vmem>>, vector<16x96xbf16>,
    } else {
    }
    return
  }
  func.func @transform_0(%arg0: i32, %arg1: i32, %arg2: i32) -> (i32, i32) {
    %c0_i32 = arith.constant 0 : i32
    return %arg0, %arg2 : i32, i32
  }
  func.func @transform_1(%arg0: i32, %arg1: i32, %arg2: i32) -> (i32, i32) {
    %c0_i32 = arith.constant 0 : i32
    return %arg2, %arg1 : i32, i32
  }
  func.func @transform_2(%arg0: i32, %arg1: i32, %arg2: i32) -> (i32, i32) {
    %c0_i32 = arith.constant 0 : i32
    %c0_i32_0 = arith.constant 0 : i32
    return %c0_i32, %arg1 : i32, i32
  }
  func.func @transform_3(%arg0: i32, %arg1: i32, %arg2: i32) -> (i32, i32) {
    %c0_i32 = arith.constant 0 : i32
    return %arg0, %arg1 : i32, i32
  }
}

module attributes {stable_mosaic.version = 11 : i64} {
  func.func @_derf_attn_kernel(%arg0: i32, %arg1: i32, %arg2: memref<1x8x3x4x8xbf16, #tpu.memory_space<vmem>>, %arg3: memref<1x8xf32, #tpu.memory_space<vmem>>, %arg4: memref<1x4x8x8xbf16, #tpu.memory_space<vmem>>) attributes {dimension_semantics = [#tpu.dimension_semantics<parallel>, #tpu.dimension_semantics<parallel>], iteration_bounds = array<i64: 2, 1>, scalar_prefetch = 0 : i64, scratch_operands = 0 : i64, tpu.core_type = #tpu.core_type<tc>, window_params = [{transform_indices = @transform_0, window_bounds = array<i64: 1, 8, 3, 4, 8>}, {pipeline_mode = #tpu.pipeline_mode<synchronous>, transform_indices = @transform_1, window_bounds = array<i64: 1, 8>}, {transform_indices = @transform_2, window_bounds = array<i64: 1, 4, 8, 8>}]} {
    %c0 = arith.constant 0 : index
    %c0_0 = arith.constant 0 : index
    %c0_1 = arith.constant 0 : index
    %c0_2 = arith.constant 0 : index
    %c0_3 = arith.constant 0 : index
    %0 = vector.load %arg2[%c0, %c0_0, %c0_1, %c0_2, %c0_3] : memref<1x8x3x4x8xbf16, #tpu.memory_space<vmem>>, vector<1x8x3x4x8xbf16>
    %1 = vector.shape_cast %0 : vector<1x8x3x4x8xbf16> to vector<8x3x4x8xbf16>
    %c0_4 = arith.constant 0 : index
    %c0_5 = arith.constant 0 : index
    %2 = vector.load %arg3[%c0_4, %c0_5] : memref<1x8xf32, #tpu.memory_space<vmem>>, vector<1x8xf32>
    %3 = vector.extract_strided_slice %1 {offsets = [0, 0, 0, 0], sizes = [8, 1, 4, 8], strides = [1, 1, 1, 1]} : vector<8x3x4x8xbf16> to vector<8x1x4x8xbf16>
    %4 = vector.shape_cast %3 : vector<8x1x4x8xbf16> to vector<8x4x8xbf16>
    %5 = arith.extf %4 : vector<8x4x8xbf16> to vector<8x4x8xf32>
    %6 = vector.shape_cast %2 : vector<1x8xf32> to vector<1x1x8xf32>
    %7 = vector.broadcast %6 : vector<1x1x8xf32> to vector<8x4x8xf32>
    %8 = arith.addf %5, %7 : vector<8x4x8xf32>
    %9 = vector.extract_strided_slice %1 {offsets = [0, 1, 0, 0], sizes = [8, 1, 4, 8], strides = [1, 1, 1, 1]} : vector<8x3x4x8xbf16> to vector<8x1x4x8xbf16>
    %10 = vector.shape_cast %9 : vector<8x1x4x8xbf16> to vector<8x4x8xbf16>
    %11 = arith.extf %10 : vector<8x4x8xbf16> to vector<8x4x8xf32>
    %12 = vector.shape_cast %2 : vector<1x8xf32> to vector<1x1x8xf32>
    %13 = vector.broadcast %12 : vector<1x1x8xf32> to vector<8x4x8xf32>
    %14 = arith.addf %11, %13 : vector<8x4x8xf32>
    %15 = vector.extract_strided_slice %1 {offsets = [0, 2, 0, 0], sizes = [8, 1, 4, 8], strides = [1, 1, 1, 1]} : vector<8x3x4x8xbf16> to vector<8x1x4x8xbf16>
    %16 = vector.shape_cast %15 : vector<8x1x4x8xbf16> to vector<8x4x8xbf16>
    %17 = arith.extf %16 : vector<8x4x8xbf16> to vector<8x4x8xf32>
    %cst = arith.constant dense<0xFF800000> : vector<8x4xf32>
    %18 = vector.multi_reduction <maximumf>, %8, %cst [2] : vector<8x4x8xf32> to vector<8x4xf32>
    %19 = vector.shape_cast %18 : vector<8x4xf32> to vector<8x4x1xf32>
    %20 = vector.broadcast %19 : vector<8x4x1xf32> to vector<8x4x8xf32>
    %21 = arith.subf %8, %20 : vector<8x4x8xf32>
    %22 = math.exp %21 : vector<8x4x8xf32>
    %cst_6 = arith.constant dense<0xFF800000> : vector<8x4xf32>
    %23 = vector.multi_reduction <maximumf>, %14, %cst_6 [2] : vector<8x4x8xf32> to vector<8x4xf32>
    %24 = vector.shape_cast %23 : vector<8x4xf32> to vector<8x4x1xf32>
    %25 = vector.broadcast %24 : vector<8x4x1xf32> to vector<8x4x8xf32>
    %26 = arith.subf %14, %25 : vector<8x4x8xf32>
    %27 = math.exp %26 : vector<8x4x8xf32>
    %28 = arith.mulf %22, %22 : vector<8x4x8xf32>
    %cst_7 = arith.constant dense<0.000000e+00> : vector<8x4xf32>
    %29 = vector.multi_reduction <add>, %28, %cst_7 [2] : vector<8x4x8xf32> to vector<8x4xf32>
    %30 = vector.shape_cast %29 : vector<8x4xf32> to vector<8x4x1xf32>
    %31 = math.rsqrt %30 : vector<8x4x1xf32>
    %32 = vector.broadcast %31 : vector<8x4x1xf32> to vector<8x4x8xf32>
    %33 = arith.mulf %22, %32 : vector<8x4x8xf32>
    %34 = arith.mulf %27, %27 : vector<8x4x8xf32>
    %cst_8 = arith.constant dense<0.000000e+00> : vector<8x4xf32>
    %35 = vector.multi_reduction <add>, %34, %cst_8 [2] : vector<8x4x8xf32> to vector<8x4xf32>
    %36 = vector.shape_cast %35 : vector<8x4xf32> to vector<8x4x1xf32>
    %37 = math.rsqrt %36 : vector<8x4x1xf32>
    %38 = vector.broadcast %37 : vector<8x4x1xf32> to vector<8x4x8xf32>
    %39 = arith.mulf %27, %38 : vector<8x4x8xf32>
    %40 = vector.extract_strided_slice %33 {offsets = [0, 0, 0], sizes = [8, 1, 8], strides = [1, 1, 1]} : vector<8x4x8xf32> to vector<8x1x8xf32>
    %41 = vector.broadcast %40 : vector<8x1x8xf32> to vector<8x4x8xf32>
    %42 = arith.mulf %41, %39 : vector<8x4x8xf32>
    %cst_9 = arith.constant dense<0.000000e+00> : vector<8x4xf32>
    %43 = vector.multi_reduction <add>, %42, %cst_9 [2] : vector<8x4x8xf32> to vector<8x4xf32>
    %44 = math.exp %43 : vector<8x4xf32>
    %cst_10 = arith.constant dense<0.000000e+00> : vector<8xf32>
    %45 = vector.multi_reduction <add>, %44, %cst_10 [1] : vector<8x4xf32> to vector<8xf32>
    %46 = vector.shape_cast %45 : vector<8xf32> to vector<8x1xf32>
    %47 = tpu.reciprocal %46 {approx = true} : vector<8x1xf32> -> vector<8x1xf32>
    %48 = vector.broadcast %47 : vector<8x1xf32> to vector<8x4xf32>
    %49 = arith.mulf %44, %48 : vector<8x4xf32>
    %50 = vector.shape_cast %49 : vector<8x4xf32> to vector<8x4x1xf32>
    %51 = vector.broadcast %50 : vector<8x4x1xf32> to vector<8x4x8xf32>
    %52 = arith.mulf %51, %17 : vector<8x4x8xf32>
    %cst_11 = arith.constant dense<0.000000e+00> : vector<8x8xf32>
    %53 = vector.multi_reduction <add>, %52, %cst_11 [1] : vector<8x4x8xf32> to vector<8x8xf32>
    %54 = arith.truncf %53 : vector<8x8xf32> to vector<8x8xbf16>
    %c0_12 = arith.constant 0 : index
    %c0_13 = arith.constant 0 : index
    %c0_14 = arith.constant 0 : index
    %c0_15 = arith.constant 0 : index
    %55 = vector.load %arg4[%c0_12, %c0_13, %c0_14, %c0_15] : memref<1x4x8x8xbf16, #tpu.memory_space<vmem>>, vector<1x1x8x8xbf16>
    %56 = vector.shape_cast %55 : vector<1x1x8x8xbf16> to vector<8x8xbf16>
    %57 = vector.shape_cast %54 : vector<8x8xbf16> to vector<1x1x8x8xbf16>
    tpu.vector_store %arg4[%c0_12, %c0_13, %c0_14, %c0_15], %57 {strides = array<i32>} : memref<1x4x8x8xbf16, #tpu.memory_space<vmem>>, vector<1x1x8x8xbf16>,
    %58 = vector.extract_strided_slice %33 {offsets = [0, 1, 0], sizes = [8, 1, 8], strides = [1, 1, 1]} : vector<8x4x8xf32> to vector<8x1x8xf32>
    %59 = vector.broadcast %58 : vector<8x1x8xf32> to vector<8x4x8xf32>
    %60 = arith.mulf %59, %39 : vector<8x4x8xf32>
    %cst_16 = arith.constant dense<0.000000e+00> : vector<8x4xf32>
    %61 = vector.multi_reduction <add>, %60, %cst_16 [2] : vector<8x4x8xf32> to vector<8x4xf32>
    %62 = math.exp %61 : vector<8x4xf32>
    %cst_17 = arith.constant dense<0.000000e+00> : vector<8xf32>
    %63 = vector.multi_reduction <add>, %62, %cst_17 [1] : vector<8x4xf32> to vector<8xf32>
    %64 = vector.shape_cast %63 : vector<8xf32> to vector<8x1xf32>
    %65 = tpu.reciprocal %64 {approx = true} : vector<8x1xf32> -> vector<8x1xf32>
    %66 = vector.broadcast %65 : vector<8x1xf32> to vector<8x4xf32>
    %67 = arith.mulf %62, %66 : vector<8x4xf32>
    %68 = vector.shape_cast %67 : vector<8x4xf32> to vector<8x4x1xf32>
    %69 = vector.broadcast %68 : vector<8x4x1xf32> to vector<8x4x8xf32>
    %70 = arith.mulf %69, %17 : vector<8x4x8xf32>
    %cst_18 = arith.constant dense<0.000000e+00> : vector<8x8xf32>
    %71 = vector.multi_reduction <add>, %70, %cst_18 [1] : vector<8x4x8xf32> to vector<8x8xf32>
    %72 = arith.truncf %71 : vector<8x8xf32> to vector<8x8xbf16>
    %c0_19 = arith.constant 0 : index
    %c1 = arith.constant 1 : index
    %c0_20 = arith.constant 0 : index
    %c0_21 = arith.constant 0 : index
    %73 = vector.load %arg4[%c0_19, %c1, %c0_20, %c0_21] : memref<1x4x8x8xbf16, #tpu.memory_space<vmem>>, vector<1x1x8x8xbf16>
    %74 = vector.shape_cast %73 : vector<1x1x8x8xbf16> to vector<8x8xbf16>
    %75 = vector.shape_cast %72 : vector<8x8xbf16> to vector<1x1x8x8xbf16>
    tpu.vector_store %arg4[%c0_19, %c1, %c0_20, %c0_21], %75 {strides = array<i32>} : memref<1x4x8x8xbf16, #tpu.memory_space<vmem>>, vector<1x1x8x8xbf16>,
    %76 = vector.extract_strided_slice %33 {offsets = [0, 2, 0], sizes = [8, 1, 8], strides = [1, 1, 1]} : vector<8x4x8xf32> to vector<8x1x8xf32>
    %77 = vector.broadcast %76 : vector<8x1x8xf32> to vector<8x4x8xf32>
    %78 = arith.mulf %77, %39 : vector<8x4x8xf32>
    %cst_22 = arith.constant dense<0.000000e+00> : vector<8x4xf32>
    %79 = vector.multi_reduction <add>, %78, %cst_22 [2] : vector<8x4x8xf32> to vector<8x4xf32>
    %80 = math.exp %79 : vector<8x4xf32>
    %cst_23 = arith.constant dense<0.000000e+00> : vector<8xf32>
    %81 = vector.multi_reduction <add>, %80, %cst_23 [1] : vector<8x4xf32> to vector<8xf32>
    %82 = vector.shape_cast %81 : vector<8xf32> to vector<8x1xf32>
    %83 = tpu.reciprocal %82 {approx = true} : vector<8x1xf32> -> vector<8x1xf32>
    %84 = vector.broadcast %83 : vector<8x1xf32> to vector<8x4xf32>
    %85 = arith.mulf %80, %84 : vector<8x4xf32>
    %86 = vector.shape_cast %85 : vector<8x4xf32> to vector<8x4x1xf32>
    %87 = vector.broadcast %86 : vector<8x4x1xf32> to vector<8x4x8xf32>
    %88 = arith.mulf %87, %17 : vector<8x4x8xf32>
    %cst_24 = arith.constant dense<0.000000e+00> : vector<8x8xf32>
    %89 = vector.multi_reduction <add>, %88, %cst_24 [1] : vector<8x4x8xf32> to vector<8x8xf32>
    %90 = arith.truncf %89 : vector<8x8xf32> to vector<8x8xbf16>
    %c0_25 = arith.constant 0 : index
    %c2 = arith.constant 2 : index
    %c0_26 = arith.constant 0 : index
    %c0_27 = arith.constant 0 : index
    %91 = vector.load %arg4[%c0_25, %c2, %c0_26, %c0_27] : memref<1x4x8x8xbf16, #tpu.memory_space<vmem>>, vector<1x1x8x8xbf16>
    %92 = vector.shape_cast %91 : vector<1x1x8x8xbf16> to vector<8x8xbf16>
    %93 = vector.shape_cast %90 : vector<8x8xbf16> to vector<1x1x8x8xbf16>
    tpu.vector_store %arg4[%c0_25, %c2, %c0_26, %c0_27], %93 {strides = array<i32>} : memref<1x4x8x8xbf16, #tpu.memory_space<vmem>>, vector<1x1x8x8xbf16>,
    %94 = vector.extract_strided_slice %33 {offsets = [0, 3, 0], sizes = [8, 1, 8], strides = [1, 1, 1]} : vector<8x4x8xf32> to vector<8x1x8xf32>
    %95 = vector.broadcast %94 : vector<8x1x8xf32> to vector<8x4x8xf32>
    %96 = arith.mulf %95, %39 : vector<8x4x8xf32>
    %cst_28 = arith.constant dense<0.000000e+00> : vector<8x4xf32>
    %97 = vector.multi_reduction <add>, %96, %cst_28 [2] : vector<8x4x8xf32> to vector<8x4xf32>
    %98 = math.exp %97 : vector<8x4xf32>
    %cst_29 = arith.constant dense<0.000000e+00> : vector<8xf32>
    %99 = vector.multi_reduction <add>, %98, %cst_29 [1] : vector<8x4xf32> to vector<8xf32>
    %100 = vector.shape_cast %99 : vector<8xf32> to vector<8x1xf32>
    %101 = tpu.reciprocal %100 {approx = true} : vector<8x1xf32> -> vector<8x1xf32>
    %102 = vector.broadcast %101 : vector<8x1xf32> to vector<8x4xf32>
    %103 = arith.mulf %98, %102 : vector<8x4xf32>
    %104 = vector.shape_cast %103 : vector<8x4xf32> to vector<8x4x1xf32>
    %105 = vector.broadcast %104 : vector<8x4x1xf32> to vector<8x4x8xf32>
    %106 = arith.mulf %105, %17 : vector<8x4x8xf32>
    %cst_30 = arith.constant dense<0.000000e+00> : vector<8x8xf32>
    %107 = vector.multi_reduction <add>, %106, %cst_30 [1] : vector<8x4x8xf32> to vector<8x8xf32>
    %108 = arith.truncf %107 : vector<8x8xf32> to vector<8x8xbf16>
    %c0_31 = arith.constant 0 : index
    %c3 = arith.constant 3 : index
    %c0_32 = arith.constant 0 : index
    %c0_33 = arith.constant 0 : index
    %109 = vector.load %arg4[%c0_31, %c3, %c0_32, %c0_33] : memref<1x4x8x8xbf16, #tpu.memory_space<vmem>>, vector<1x1x8x8xbf16>
    %110 = vector.shape_cast %109 : vector<1x1x8x8xbf16> to vector<8x8xbf16>
    %111 = vector.shape_cast %108 : vector<8x8xbf16> to vector<1x1x8x8xbf16>
    tpu.vector_store %arg4[%c0_31, %c3, %c0_32, %c0_33], %111 {strides = array<i32>} : memref<1x4x8x8xbf16, #tpu.memory_space<vmem>>, vector<1x1x8x8xbf16>,
    return
  }
  func.func @transform_0(%arg0: i32, %arg1: i32) -> (i32, i32, i32, i32, i32) {
    %c0_i32 = arith.constant 0 : i32
    %c0_i32_0 = arith.constant 0 : i32
    %c0_i32_1 = arith.constant 0 : i32
    %c0_i32_2 = arith.constant 0 : i32
    return %arg0, %arg1, %c0_i32, %c0_i32_0, %c0_i32_1 : i32, i32, i32, i32, i32
  }
  func.func @transform_1(%arg0: i32, %arg1: i32) -> (i32, i32) {
    %c0_i32 = arith.constant 0 : i32
    %c0_i32_0 = arith.constant 0 : i32
    %c0_i32_1 = arith.constant 0 : i32
    return %c0_i32, %c0_i32_0 : i32, i32
  }
  func.func @transform_2(%arg0: i32, %arg1: i32) -> (i32, i32, i32, i32) {
    %c0_i32 = arith.constant 0 : i32
    %c0_i32_0 = arith.constant 0 : i32
    %c0_i32_1 = arith.constant 0 : i32
    return %arg0, %c0_i32, %arg1, %c0_i32_0 : i32, i32, i32, i32
  }
}

module attributes {stable_mosaic.version = 11 : i64} {
  func.func @_matmul_bias_kernel(%arg0: i32, %arg1: i32, %arg2: i32, %arg3: memref<16x32xbf16, #tpu.memory_space<vmem>>, %arg4: memref<32x32xbf16, #tpu.memory_space<vmem>>, %arg5: memref<1x32xf32, #tpu.memory_space<vmem>>, %arg6: memref<16x32xf32, #tpu.memory_space<vmem>>, %arg7: memref<16x32xf32, #tpu.memory_space<vmem>>) attributes {dimension_semantics = [#tpu.dimension_semantics<parallel>, #tpu.dimension_semantics<parallel>, #tpu.dimension_semantics<arbitrary>], iteration_bounds = array<i64: 1, 1, 1>, scalar_prefetch = 0 : i64, scratch_operands = 1 : i64, tpu.core_type = #tpu.core_type<tc>, window_params = [{transform_indices = @transform_0, window_bounds = array<i64: 16, 32>}, {transform_indices = @transform_1, window_bounds = array<i64: 32, 32>}, {transform_indices = @transform_2, window_bounds = array<i64: 1, 32>}, {transform_indices = @transform_3, window_bounds = array<i64: 16, 32>}]} {
    %c0_i32 = arith.constant 0 : i32
    %0 = arith.cmpi eq, %arg2, %c0_i32 : i32
    %1 = arith.extui %0 : i1 to i32
    %c0_i32_0 = arith.constant 0 : i32
    %2 = arith.cmpi ne, %1, %c0_i32_0 : i32
    scf.if %2 {
      %cst_10 = arith.constant 0.000000e+00 : f32
      %12 = vector.broadcast %cst_10 : f32 to vector<16x32xf32>
      %c0_11 = arith.constant 0 : index
      %c0_12 = arith.constant 0 : index
      %13 = vector.load %arg7[%c0_11, %c0_12] : memref<16x32xf32, #tpu.memory_space<vmem>>, vector<16x32xf32>
      tpu.vector_store %arg7[%c0_11, %c0_12], %12 {strides = array<i32>} : memref<16x32xf32, #tpu.memory_space<vmem>>, vector<16x32xf32>,
    } else {
    }
    %c0 = arith.constant 0 : index
    %c0_1 = arith.constant 0 : index
    %3 = vector.load %arg7[%c0, %c0_1] : memref<16x32xf32, #tpu.memory_space<vmem>>, vector<16x32xf32>
    %c0_2 = arith.constant 0 : index
    %c0_3 = arith.constant 0 : index
    %4 = vector.load %arg3[%c0_2, %c0_3] : memref<16x32xbf16, #tpu.memory_space<vmem>>, vector<16x32xbf16>
    %c0_4 = arith.constant 0 : index
    %c0_5 = arith.constant 0 : index
    %5 = vector.load %arg4[%c0_4, %c0_5] : memref<32x32xbf16, #tpu.memory_space<vmem>>, vector<32x32xbf16>
    %cst = arith.constant dense<0.000000e+00> : vector<16x32xf32>
    %6 = tpu.matmul %4, %5, %cst {dimension_numbers = #tpu.dot_dimension_numbers<[1], [0], [0], [1], [0, 0, 1, 1], [], []>} : vector<16x32xbf16>, vector<32x32xbf16>, vector<16x32xf32> -> vector<16x32xf32>
    %7 = arith.addf %3, %6 : vector<16x32xf32>
    %c0_6 = arith.constant 0 : index
    %c0_7 = arith.constant 0 : index
    %8 = vector.load %arg7[%c0_6, %c0_7] : memref<16x32xf32, #tpu.memory_space<vmem>>, vector<16x32xf32>
    tpu.vector_store %arg7[%c0_6, %c0_7], %7 {strides = array<i32>} : memref<16x32xf32, #tpu.memory_space<vmem>>, vector<16x32xf32>,
    %c0_i32_8 = arith.constant 0 : i32
    %9 = arith.cmpi eq, %arg2, %c0_i32_8 : i32
    %10 = arith.extui %9 : i1 to i32
    %c0_i32_9 = arith.constant 0 : i32
    %11 = arith.cmpi ne, %10, %c0_i32_9 : i32
    scf.if %11 {
      %c0_10 = arith.constant 0 : index
      %c0_11 = arith.constant 0 : index
      %12 = vector.load %arg7[%c0_10, %c0_11] : memref<16x32xf32, #tpu.memory_space<vmem>>, vector<16x32xf32>
      %c0_12 = arith.constant 0 : index
      %c0_13 = arith.constant 0 : index
      %13 = vector.load %arg5[%c0_12, %c0_13] : memref<1x32xf32, #tpu.memory_space<vmem>>, vector<1x32xf32>
      %14 = vector.broadcast %13 : vector<1x32xf32> to vector<16x32xf32>
      %15 = arith.addf %12, %14 : vector<16x32xf32>
      %c0_14 = arith.constant 0 : index
      %c0_15 = arith.constant 0 : index
      %16 = vector.load %arg6[%c0_14, %c0_15] : memref<16x32xf32, #tpu.memory_space<vmem>>, vector<16x32xf32>
      tpu.vector_store %arg6[%c0_14, %c0_15], %15 {strides = array<i32>} : memref<16x32xf32, #tpu.memory_space<vmem>>, vector<16x32xf32>,
    } else {
    }
    return
  }
  func.func @transform_0(%arg0: i32, %arg1: i32, %arg2: i32) -> (i32, i32) {
    %c0_i32 = arith.constant 0 : i32
    return %arg0, %arg2 : i32, i32
  }
  func.func @transform_1(%arg0: i32, %arg1: i32, %arg2: i32) -> (i32, i32) {
    %c0_i32 = arith.constant 0 : i32
    return %arg2, %arg1 : i32, i32
  }
  func.func @transform_2(%arg0: i32, %arg1: i32, %arg2: i32) -> (i32, i32) {
    %c0_i32 = arith.constant 0 : i32
    %c0_i32_0 = arith.constant 0 : i32
    return %c0_i32, %arg1 : i32, i32
  }
  func.func @transform_3(%arg0: i32, %arg1: i32, %arg2: i32) -> (i32, i32) {
    %c0_i32 = arith.constant 0 : i32
    return %arg0, %arg1 : i32, i32
  }
}

</mosaic_0001>

<bundles_post_ra>
// kernel: custom_bert_self_attention.3
= control target key start
LH: loop header
LB: loop body
LE: loop exit
PB: predicated region body
PF: predicated region fallthrough
CT: control target
= control target key end

     0   :  { %vm19_vm0 = vcmask 785408   ;;  %v151_v0 = vmov 0.0   ;;  %vm152_vm1 = vmmov 0   ;;  %vm47_vm2 = vcmask 261120   ;;  %s195_s1 = inlined_call_operand.vmem [shape: bf16[32,96], index: 1, kind: input, shape index: {}]   ;;  %s196_s0 = inlined_call_operand.vmem [shape: bf16[16,32], index: 0, kind: input, shape index: {}]   ;;  %s197_s2 = inlined_call_operand.vmem [shape: f32[1,96], index: 2, kind: input, shape index: {}]   ;;  %s198_s3 = inlined_call_operand.vmem [shape: bf16[16,96], index: 3, kind: output, shape index: {}]  }
   0x1   :  { %138 = vmatprep.subr.bf16.mxu0 %v151_v0  ;;  %v148_v1 = vld [vmem:[%s195_s1] sm:$0xff]   ;;  %142 = vmatprep.mubr.msk.bf16.mxu0 %vm152_vm1, %v151_v0  ;;  %20 = vst.msk [vmem:[#allocation2] sm:$0xff] %vm19_vm0, %v151_v0  ;;  %21 = vst.msk [vmem:[#allocation2 + $0x8] sm:$0xff] %vm19_vm0, %v151_v0  ;;  %v149_v2 = vld [vmem:[%s195_s1 + $0x8] sm:$0xff]   ;;  %vm119_vm3 = vcmask 781312  }
   0x2   :  { %139 = vmatpush3.bf16.msra.mxu0 %v148_v1  ;;  %v150_v3 = vld [vmem:[%s196_s0] sm:$0xff]  }
   0x3   :  { %140 = vmatprep.subr.bf16.mxu0 %v151_v0  ;;  %v130_v12 = vld [vmem:[%s197_s2] ss:$0 sm:$0xff] }
   0x6   :  { %141 = vmatpush3.bf16.msra.mxu0 %v149_v2 }
   0x8   :  { %v22_v4 = vld [vmem:[#allocation2] sm:$0xff]  ;;  %v23_v6 = vld [vmem:[#allocation2 + $0x8] sm:$0xff] }
   0x9   :  { %143 = vmatmul.mubr.msk.bf16.vlgmr.msra.gmra.mrb[0].mxu0 %vm47_vm2, %v150_v3 }
  0xdc   :  { %v85_v5 = vpop.f32.mrb[0].mxu0 }
  0xdd   :  { %v92_v7 = vadd.f32 %v85_v5, %v22_v4  ;;  %v144_v8 = vpop.f32.mrb[1].mxu0 }
  0xde   :  { %v88_v9 = vpop.f32.mrb[2].mxu0 }
  0xdf   :  { %95 = vst.msk [vmem:[#allocation2] sm:$0xff] %vm19_vm0, %v92_v7  ;;  %v93_v10 = vadd.f32 %v88_v9, %v23_v6  ;;  %v145_v11 = vpop.f32.mrb[3].mxu0 }
  0xe1   :  { %96 = vst.msk [vmem:[#allocation2 + $0x8] sm:$0xff] %vm19_vm0, %v93_v10 }
  0xe6   :  { %v100_v13 = vld [vmem:[#allocation2] sm:$0xff] }
  0xe7   :  { %v109_v14 = vadd.f32 %v130_v12, %v100_v13 }
  0xe8   :  { %v101_v15 = vld [vmem:[#allocation2 + $0x8] sm:$0xff] }
  0xe9   :  { %v133_v16 = vpack.c.bf16 %v109_v14, %v109_v14  ;;  %v110_v17 = vadd.f32 %v130_v12, %v101_v15 }
  0xeb   :  { %120 = vst.msk [vmem:[%s198_s3] sm:$0xf] %vm119_vm3, %v133_v16  ;;  %v134_v18 = vpack.c.bf16 %v110_v17, %v110_v17 }
  0xed   :  { %121 = vst.msk [vmem:[%s198_s3 + $0x4] sm:$0xf] %vm119_vm3, %v134_v18 }

// kernel: custom_bert_self_attention.5
= control target key start
LH: loop header
LB: loop body
LE: loop exit
PB: predicated region body
PF: predicated region fallthrough
CT: control target
= control target key end

     0   :  { %v177_v1 = vmov 0.0   ;;  %vm178_vm0 = vmmov 0   ;;  %vm20_vm1 = vcmask 261120   ;;  %s233_s0 = inlined_call_operand.vmem [shape: bf16[16,32], index: 0, kind: input, shape index: {}]   ;;  %s234_s1 = inlined_call_operand.vmem [shape: bf16[32,32], index: 1, kind: input, shape index: {}]   ;;  %s235_s2 = inlined_call_operand.vmem [shape: f32[1,32], index: 2, kind: input, shape index: {}]   ;;  %s236_s3 = inlined_call_operand.hbm [shape: f32[16,32], index: 3, kind: output, shape index: {}]  }
   0x1   :  { %v150_v0 = vld [vmem:[%s234_s1] sm:$0xff]   ;;  %137 = vmatprep.subr.bf16.mxu0 %v177_v1  ;;  %v151_v2 = vld [vmem:[%s234_s1 + $0x8] sm:$0xff]   ;;  %141 = vmatprep.mubr.msk.bf16.mxu0 %vm178_vm0, %v177_v1  ;;  %21 = vst.msk [vmem:[#allocation2] sm:$0xff] %vm20_vm1, %v177_v1  ;;  %22 = vst.msk [vmem:[#allocation2 + $0x8] sm:$0xff] %vm20_vm1, %v177_v1 }
   0x2   :  { %138 = vmatpush3.bf16.msra.mxu0 %v150_v0 }
   0x3   :  { %139 = vmatprep.subr.bf16.mxu0 %v177_v1 }
   0x4   :  { %8 = vsyncpa [#allocation4], 0  ;;  %v152_v3 = vld [vmem:[%s233_s0] sm:$0xff]   ;;  %s179_s0 = smov [#allocation3]  }
   0x5   :  { %v133_v12 = vld [vmem:[%s235_s2] ss:$0 sm:$0xff]  ;;  %s118_s19 = sshll.u32 %s179_s0, 4  ;;  %s119_s19 = int_to_ptr.vmem [resolvable:$true] %s118_s19 }
   0x6   :  { %140 = vmatpush3.bf16.msra.mxu0 %v151_v2  ;;  %s153_s20 = scalar_lea.vmem %s119_s19, 256  ;;  %p158_p1 = scmp.lt.s32.totalorder %s119_s19, %s119_s19 }
   0x7   :  { %p154_p0 = scmp.ne.s32.totalorder %s119_s19, %s153_s20  ;;  %p159_p2 = scmp.lt.s32.totalorder %s153_s20, %s153_s20 }
   0x8   :  { %v23_v4 = vld [vmem:[#allocation2] sm:$0xff]  ;;  %v24_v6 = vld [vmem:[#allocation2 + $0x8] sm:$0xff] }
   0x9   :  { %142 = vmatmul.mubr.msk.bf16.vlgmr.msra.gmra.mrb[0].mxu0 %vm20_vm1, %v152_v3  ;;  %p160_p3 = por %p159_p2, %p158_p1 }
   0xb   :  { %p161_p4 = pnand %p160_p3, %p154_p0 }
  0xdc   :  { %v86_v5 = vpop.f32.mrb[0].mxu0 }
  0xdd   :  { %v93_v7 = vadd.f32 %v86_v5, %v23_v4  ;;  %v143_v8 = vpop.f32.mrb[1].mxu0 }
  0xde   :  { %v89_v9 = vpop.f32.mrb[2].mxu0 }
  0xdf   :  { %95 = vst.msk [vmem:[#allocation2] sm:$0xff] %vm20_vm1, %v93_v7  ;;  %v94_v10 = vadd.f32 %v89_v9, %v24_v6  ;;  %v144_v11 = vpop.f32.mrb[3].mxu0 }
  0xe1   :  { %96 = vst.msk [vmem:[#allocation2 + $0x8] sm:$0xff] %vm20_vm1, %v94_v10 }
  0xe6   :  { %v100_v13 = vld [vmem:[#allocation2] sm:$0xff] }
  0xe7   :  { %v109_v14 = vadd.f32 %v133_v12, %v100_v13 }
  0xe8   :  { %v101_v15 = vld [vmem:[#allocation2 + $0x8] sm:$0xff] }
  0xe9   :  { %v110_v16 = vadd.f32 %v133_v12, %v101_v15  ;;  %111 = vst.msk [vmem:[#allocation3] sm:$0xff] %vm20_vm1, %v109_v14 }
  0xeb   :  { %112 = vst.msk [vmem:[#allocation3 + $0x8] sm:$0xff] %vm20_vm1, %v110_v16 }
  0xec   :  { %164 = shalt.err (!%p161_p4)
}
  0xed   :  { %s165_s22 = scalar_lea.hbm %s236_s3, 256 }
  0xee   :  { %p166_p5 = scmp.ne.s32.totalorder %s236_s3, %s165_s22  ;;  %p169_p6 = scmp.lt.u32.totalorder %s165_s22, %s236_s3 }
  0xf0   :  { %p171_p7 = pnand %p169_p6, %p166_p5 }
  0xf2   :  { %174 = shalt.err (!%p171_p7)
}
  0xf3   :  { %s180_s27 = smov 128   ;;  %s181_s28 = smov 8  }
  0xf4   :  { %124 = dma.vmem_to_hbm [thread:$0]  %s119_s19, 256, %s236_s3, [#allocation4], %s180_s27, %s180_s27, %s181_s28  }
  0xf5   :  { %175 = dma.done.wait [#allocation4], 256  }
  0xf6   :  { %176 = vsyncadd [#allocation4], 4294967040 }
  0xf7   :  { %128 = vsyncpa [#allocation4], 1 }

// kernel: custom_bert_self_attention.4
= control target key start
LH: loop header
LB: loop body
LE: loop exit
PB: predicated region body
PF: predicated region fallthrough
CT: control target
= control target key end

     0   :  { %s2169_s9 = smov 0   ;;  %s2171_s10 = smov 0   ;;  %s2967_s0 = inlined_call_operand.vmem [shape: bf16[2,8,3,4,8], index: 0, kind: input, shape index: {}]   ;;  %s2968_s1 = inlined_call_operand.vmem [shape: f32[1,8], index: 1, kind: input, shape index: {}]   ;;  %s2969_s2 = inlined_call_operand.vmem [shape: bf16[2,4,8,8], index: 2, kind: output, shape index: {}]  }
   0x1   :  { %s2173_s11 = smov 0  }
   0x2 LB: > { %s24_s12 = sadd.s32 1, %s2147_s10  ;;  %p1890_p0 = scmp.ge.s32.totalorder %s2151_s11, 1  ;;  %s2151_s11 = sphi %s2173_s11, %s12_s11   ;;  %s2147_s10 = sphi %s2171_s10, %s2971_s10   ;;  %s2143_s9 = sphi %s2169_s9, %s2970_s9  }
   0x3   : > { %p26_p1 = scmp.ge.s32.totalorder %s24_s12, 2  ;;  %p134_p2 = scmp.lt.s32.totalorder %s2151_s11, 3 }
   0x5   : > { %s2973_s12 = smov (%p26_p1, %s24_s12), 0  ;;  %p135_p3 = pnand %p1890_p0, %p134_p2 }
   0x6   : > { %p165_p4 = scmp.lt.s32.totalorder (!%p135_p3), %s2143_s9, 1  ;;  %v2198_v0 = vld [vmem:[%s2968_s1] ss:$0 sm:$0xff] (!%p135_p3)  ;;  %vm254_vm0 = vcmask (!%p135_p3), 60416   ;;  %vm569_vm1 = vcmask (!%p135_p3), 1041409   ;;  %vm571_vm2 = vcmask (!%p135_p3), 1042434  }
   0x7   : > { %138 = sbr.rel (%p135_p3) target bundleno = 962 (0x3c2), region = 28  ;;  %vm573_vm3 = vcmask (!%p135_p3), 1043459   ;;  %vm575_vm4 = vcmask (!%p135_p3), 1044484   ;;  %vm577_vm5 = vcmask (!%p135_p3), 1045509   ;;  %vm579_vm6 = vcmask (!%p135_p3), 1046534  }
   0x8   : > { %vm581_vm7 = vcmask (!%p135_p3), 1047559   ;;  %vm584_vm8 = vcmask (!%p135_p3), 31744  }
   0xe   : > { %s2975_s9 = smov (!%p165_p4, %s2143_s9), 1 }
   0xf   : > { %s1965_s13 = smul.u32 48, %s2975_s9  ;;  %s1932_s19 = sshll.u32 %s2975_s9, 4 }
  0x10   : > { %s2870_s22 = scalar_lea.vmem %s2969_s2, %s1932_s19 }
  0x11   : > { %s2193_s16 = scalar_lea.vmem %s2967_s0, %s1965_s13 }
  0x12   : > { %v183_v1 = vld [vmem:[%s2193_s16] sm:$0x3]  ;;  %v189_v2 = vld [vmem:[%s2193_s16 + $0xc] sm:$0x3]  ;;  %v186_v3 = vld [vmem:[%s2193_s16 + $0x6] sm:$0x3] }
  0x13   : > { %v208_v4 = vunpack.c.l.bf16 %v183_v1  ;;  %v210_v5 = vunpack.c.l.bf16 %v189_v2  ;;  %v209_v6 = vunpack.c.l.bf16 %v186_v3  ;;  %v192_v7 = vld [vmem:[%s2193_s16 + $0x12] sm:$0x3]  ;;  %v184_v8 = vld [vmem:[%s2193_s16 + $0x2] sm:$0x3]  ;;  %v187_v9 = vld [vmem:[%s2193_s16 + $0x8] sm:$0x3] }
  0x14   : > { %v211_v10 = vunpack.c.l.bf16 %v192_v7  ;;  %v230_v11 = vunpack.c.l.bf16 %v184_v8  ;;  %v231_v15 = vunpack.c.l.bf16 %v187_v9  ;;  %v195_v16 = vld [vmem:[%s2193_s16 + $0x18] sm:$0x3]  ;;  %v190_v18 = vld [vmem:[%s2193_s16 + $0xe] sm:$0x3]  ;;  %v198_v27 = vld [vmem:[%s2193_s16 + $0x1e] sm:$0x3] }
  0x15   : > { %v2207_v12 = vadd.f32 %v2198_v0, %v208_v4  ;;  %v2210_v13 = vadd.f32 %v2198_v0, %v210_v5  ;;  %v2213_v14 = vadd.f32 %v2198_v0, %v209_v6  ;;  %v212_v22 = vunpack.c.l.bf16 %v195_v16  ;;  %v193_v28 = vld [vmem:[%s2193_s16 + $0x14] sm:$0x3]  ;;  %v201_v35 = vld [vmem:[%s2193_s16 + $0x24] sm:$0x3]  ;;  %v196_v36 = vld [vmem:[%s2193_s16 + $0x1a] sm:$0x3] }
  0x16   : > { %v2217_v17 = vadd.f32 %v2198_v0, %v211_v10  ;;  %v2225_v21 = vadd.f32 %v2198_v0, %v230_v11  ;;  %v2232_v25 = vadd.f32 %v2198_v0, %v231_v15  ;;  %v232_v26 = vunpack.c.l.bf16 %v190_v18  ;;  %v204_v43 = vld [vmem:[%s2193_s16 + $0x2a] sm:$0x3]  ;;  %v199_v44 = vld [vmem:[%s2193_s16 + $0x20] sm:$0x3]  ;;  %v202_v51 = vld [vmem:[%s2193_s16 + $0x26] sm:$0x3] }
  0x17   : > { %v255_v19 = vsel %vm254_vm0, %v2207_v12, -inf  ;;  %v261_v20 = vsel %vm254_vm0, %v2210_v13, -inf  ;;  %v258_v23 = vsel %vm254_vm0, %v2213_v14, -inf  ;;  %v2239_v30 = vadd.f32 %v2198_v0, %v212_v22  ;;  %v205_v52 = vld [vmem:[%s2193_s16 + $0x2c] sm:$0x3] }
  0x18   : > { %256 = vmax.xlane.f32.xlu0 %v255_v19  ;;  %262 = vmax.xlane.f32.xlu1 %v261_v20  ;;  %v264_v24 = vsel %vm254_vm0, %v2217_v17, -inf  ;;  %v303_v29 = vsel %vm254_vm0, %v2225_v21, -inf  ;;  %v306_v31 = vsel %vm254_vm0, %v2232_v25, -inf  ;;  %v2244_v32 = vadd.f32 %v2198_v0, %v232_v26 }
  0x19   : > { %v213_v33 = vunpack.c.l.bf16 %v198_v27  ;;  %v233_v34 = vunpack.c.l.bf16 %v193_v28  ;;  %v267_v37 = vsel %vm254_vm0, %v2239_v30, -inf  ;;  %v214_v38 = vunpack.c.l.bf16 %v201_v35 }
  0x1a   : > { %v309_v39 = vsel %vm254_vm0, %v2244_v32, -inf  ;;  %v234_v42 = vunpack.c.l.bf16 %v196_v36  ;;  %v215_v45 = vunpack.c.l.bf16 %v204_v43  ;;  %v235_v46 = vunpack.c.l.bf16 %v199_v44 }
  0x1b   : > { %v2253_v40 = vadd.f32 %v2198_v0, %v213_v33  ;;  %v2256_v41 = vadd.f32 %v2198_v0, %v233_v34  ;;  %v2265_v49 = vadd.f32 %v2198_v0, %v214_v38  ;;  %v236_v54 = vunpack.c.l.bf16 %v202_v51 }
  0x1c   : > { %259 = vmax.xlane.f32.xlu0 %v258_v23  ;;  %265 = vmax.xlane.f32.xlu1 %v264_v24  ;;  %v2268_v50 = vadd.f32 %v2198_v0, %v234_v42  ;;  %v2273_v53 = vadd.f32 %v2198_v0, %v215_v45  ;;  %v2280_v57 = vadd.f32 %v2198_v0, %v235_v46  ;;  %v237_v58 = vunpack.c.l.bf16 %v205_v52 }
  0x1d   : > { %v270_v47 = vsel %vm254_vm0, %v2253_v40, -inf  ;;  %v312_v48 = vsel %vm254_vm0, %v2256_v41, -inf  ;;  %v273_v55 = vsel %vm254_vm0, %v2265_v49, -inf  ;;  %v2287_v61 = vadd.f32 %v2198_v0, %v236_v54 }
  0x1e   : > { %v315_v56 = vsel %vm254_vm0, %v2268_v50, -inf  ;;  %v276_v59 = vsel %vm254_vm0, %v2273_v53, -inf  ;;  %v318_v60 = vsel %vm254_vm0, %v2280_v57, -inf  ;;  %v2290_v62 = vadd.f32 %v2198_v0, %v237_v58 }
  0x1f   : > { %v321_v63 = vsel %vm254_vm0, %v2287_v61, -inf }
  0x20   : > { %304 = vmax.xlane.f32.xlu0 %v303_v29  ;;  %307 = vmax.xlane.f32.xlu1 %v306_v31  ;;  %v324_v1 = vsel %vm254_vm0, %v2290_v62, -inf }
  0x24   : > { %268 = vmax.xlane.f32.xlu0 %v267_v37  ;;  %310 = vmax.xlane.f32.xlu1 %v309_v39 }
  0x28   : > { %271 = vmax.xlane.f32.xlu0 %v270_v47  ;;  %313 = vmax.xlane.f32.xlu1 %v312_v48 }
  0x2c   : > { %274 = vmax.xlane.f32.xlu0 %v273_v55  ;;  %316 = vmax.xlane.f32.xlu1 %v315_v56 }
  0x30   : > { %277 = vmax.xlane.f32.xlu0 %v276_v59  ;;  %319 = vmax.xlane.f32.xlu1 %v318_v60 }
  0x34   : > { %322 = vmax.xlane.f32.xlu0 %v321_v63  ;;  %325 = vmax.xlane.f32.xlu1 %v324_v1 }
  0xa5   : > { %v257_v2 = vpop.xlane.xlu0 %256  ;;  %v263_v3 = vpop.xlane.xlu1 %262 }
  0xa6   : > { %v279_v4 = vsub.f32 %v2207_v12, %v257_v2  ;;  %v281_v5 = vsub.f32 %v2210_v13, %v263_v3 }
  0xa8   : > { %v287_v6 = vmul.f32 1.442695, %v279_v4  ;;  %v291_v7 = vmul.f32 1.442695, %v281_v5 }
  0xa9   : > { %v260_v0 = vpop.xlane.xlu0 %259  ;;  %v266_v8 = vpop.xlane.xlu1 %265 }
  0xaa   : > { %1993 = vpow2.f32 %v287_v6  ;;  %v280_v9 = vsub.f32 %v2213_v14, %v260_v0  ;;  %v282_v10 = vsub.f32 %v2217_v17, %v266_v8 }
  0xab   : > { %1995 = vpow2.f32 %v291_v7 }
  0xac   : > { %v289_v11 = vmul.f32 1.442695, %v280_v9  ;;  %v293_v15 = vmul.f32 1.442695, %v282_v10 }
  0xad   : > { %v305_v16 = vpop.xlane.xlu0 %304  ;;  %v308_v18 = vpop.xlane.xlu1 %307 }
  0xae   : > { %1997 = vpow2.f32 %v289_v11  ;;  %v327_v19 = vsub.f32 %v2225_v21, %v305_v16  ;;  %v328_v12 = vsub.f32 %v2232_v25, %v308_v18 }
  0xaf   : > { %1999 = vpow2.f32 %v293_v15 }
  0xb0   : > { %v335_v13 = vmul.f32 1.442695, %v327_v19  ;;  %v337_v20 = vmul.f32 1.442695, %v328_v12 }
  0xb1   : > { %v269_v22 = vpop.xlane.xlu0 %268  ;;  %v311_v23 = vpop.xlane.xlu1 %310 }
  0xb2   : > { %2001 = vpow2.f32 %v335_v13  ;;  %v283_v14 = vsub.f32 %v2239_v30, %v269_v22  ;;  %v329_v17 = vsub.f32 %v2244_v32, %v311_v23 }
  0xb3   : > { %2003 = vpow2.f32 %v337_v20 }
  0xb4   : > { %v2304_v24 = vpop.eup %1993  ;;  %v295_v26 = vmul.f32 1.442695, %v283_v14  ;;  %v339_v27 = vmul.f32 1.442695, %v329_v17 }
  0xb5   : > { %v2306_v28 = vpop.eup %1995  ;;  %v272_v21 = vpop.xlane.xlu0 %271  ;;  %v351_v25 = vmul.f32 %v2304_v24, %v2304_v24 }
  0xb6   : > { %v314_v29 = vpop.xlane.xlu1 %313  ;;  %2005 = vpow2.f32 %v295_v26  ;;  %v284_v31 = vsub.f32 %v2253_v40, %v272_v21  ;;  %v353_v30 = vmul.f32 %v2306_v28, %v2306_v28 }
  0xb7   : > { %v330_v33 = vsub.f32 %v2256_v41, %v314_v29  ;;  %2007 = vpow2.f32 %v339_v27  ;;  %v359_v32 = vsel %vm254_vm0, %v351_v25, 0.0 }
  0xb8   : > { %v2315_v34 = vpop.eup %1997  ;;  %v297_v35 = vmul.f32 1.442695, %v284_v31  ;;  %360 = vadd.xlane.f32.xlu0 %v359_v32  ;;  %v365_v39 = vsel %vm254_vm0, %v353_v30, 0.0 }
  0xb9   : > { %v341_v36 = vmul.f32 1.442695, %v330_v33  ;;  %v2317_v37 = vpop.eup %1999  ;;  %v275_v38 = vpop.xlane.xlu0 %274  ;;  %v352_v40 = vmul.f32 %v2315_v34, %v2315_v34 }
  0xba   : > { %v317_v41 = vpop.xlane.xlu1 %316  ;;  %2009 = vpow2.f32 %v297_v35  ;;  %v285_v42 = vsub.f32 %v2265_v49, %v275_v38  ;;  %v354_v44 = vmul.f32 %v2317_v37, %v2317_v37 }
  0xbb   : > { %v331_v43 = vsub.f32 %v2268_v50, %v317_v41  ;;  %2011 = vpow2.f32 %v341_v36  ;;  %v362_v45 = vsel %vm254_vm0, %v352_v40, 0.0 }
  0xbc   : > { %v2327_v46 = vpop.eup %2001  ;;  %v299_v47 = vmul.f32 1.442695, %v285_v42  ;;  %366 = vadd.xlane.f32.xlu0 %v365_v39  ;;  %363 = vadd.xlane.f32.xlu1 %v362_v45  ;;  %v368_v54 = vsel %vm254_vm0, %v354_v44, 0.0  ;;  %v447_v42 = vlaneseq }
  0xbd   : > { %v343_v48 = vmul.f32 1.442695, %v331_v43  ;;  %v2329_v51 = vpop.eup %2003  ;;  %v278_v52 = vpop.xlane.xlu0 %277  ;;  %v399_v49 = vmul.f32 %v2327_v46, %v2327_v46 }
  0xbe   : > { %v320_v50 = vpop.xlane.xlu1 %319  ;;  %2013 = vpow2.f32 %v299_v47  ;;  %v286_v55 = vsub.f32 %v2273_v53, %v278_v52  ;;  %v400_v58 = vmul.f32 %v2329_v51, %v2329_v51  ;;  %v2393_v45 = vshrl.u32 %v447_v42, 7 }
  0xbf   : > { %v332_v56 = vsub.f32 %v2280_v57, %v320_v50  ;;  %2015 = vpow2.f32 %v343_v48  ;;  %v407_v59 = vsel %vm254_vm0, %v399_v49, 0.0 }
  0xc0   : > { %v2339_v60 = vpop.eup %2005  ;;  %v301_v63 = vmul.f32 1.442695, %v286_v55  ;;  %369 = vadd.xlane.f32.xlu1 %v368_v54  ;;  %408 = vadd.xlane.f32.xlu0 %v407_v59  ;;  %v410_v4 = vsel %vm254_vm0, %v400_v58, 0.0  ;;  %v2399_v50 = vsub.s32 0, %v2393_v45 }
  0xc1   : > { %v345_v1 = vmul.f32 1.442695, %v332_v56  ;;  %v2341_v2 = vpop.eup %2007  ;;  %v323_v3 = vpop.xlane.xlu0 %322  ;;  %v355_v53 = vmul.f32 %v2339_v60, %v2339_v60 }
  0xc2   : > { %v326_v57 = vpop.xlane.xlu1 %325  ;;  %2017 = vpow2.f32 %v301_v63  ;;  %v333_v5 = vsub.f32 %v2287_v61, %v323_v3  ;;  %v401_v7 = vmul.f32 %v2341_v2, %v2341_v2 }
  0xc3   : > { %v334_v6 = vsub.f32 %v2290_v62, %v326_v57  ;;  %2019 = vpow2.f32 %v345_v1  ;;  %v371_v0 = vsel %vm254_vm0, %v355_v53, 0.0 }
  0xc4   : > { %v2351_v8 = vpop.eup %2009  ;;  %v347_v9 = vmul.f32 1.442695, %v333_v5  ;;  %411 = vadd.xlane.f32.xlu1 %v410_v4  ;;  %372 = vadd.xlane.f32.xlu0 %v371_v0  ;;  %v413_v15 = vsel %vm254_vm0, %v401_v7, 0.0 }
  0xc5   : > { %v349_v10 = vmul.f32 1.442695, %v334_v6  ;;  %v2353_v11 = vpop.eup %2011  ;;  %v356_v61 = vmul.f32 %v2351_v8, %v2351_v8 }
  0xc6   : > { %2021 = vpow2.f32 %v347_v9  ;;  %v402_v62 = vmul.f32 %v2353_v11, %v2353_v11 }
  0xc7   : > { %2023 = vpow2.f32 %v349_v10  ;;  %v374_v16 = vsel %vm254_vm0, %v356_v61, 0.0 }
  0xc8   : > { %v2361_v18 = vpop.eup %2013  ;;  %414 = vadd.xlane.f32.xlu1 %v413_v15  ;;  %375 = vadd.xlane.f32.xlu0 %v374_v16  ;;  %v416_v12 = vsel %vm254_vm0, %v402_v62, 0.0 }
  0xc9   : > { %v2363_v19 = vpop.eup %2015  ;;  %v357_v13 = vmul.f32 %v2361_v18, %v2361_v18 }
  0xca   : > { %v403_v20 = vmul.f32 %v2363_v19, %v2363_v19 }
  0xcb   : > { %v377_v22 = vsel %vm254_vm0, %v357_v13, 0.0 }
  0xcc   : > { %v2371_v23 = vpop.eup %2017  ;;  %417 = vadd.xlane.f32.xlu1 %v416_v12  ;;  %378 = vadd.xlane.f32.xlu0 %v377_v22  ;;  %v419_v17 = vsel %vm254_vm0, %v403_v20, 0.0 }
  0xcd   : > { %v2373_v14 = vpop.eup %2019  ;;  %v358_v26 = vmul.f32 %v2371_v23, %v2371_v23 }
  0xce   : > { %v404_v27 = vmul.f32 %v2373_v14, %v2373_v14 }
  0xcf   : > { %v380_v21 = vsel %vm254_vm0, %v358_v26, 0.0 }
  0xd0   : > { %v2381_v25 = vpop.eup %2021  ;;  %420 = vadd.xlane.f32.xlu1 %v419_v17  ;;  %381 = vadd.xlane.f32.xlu0 %v380_v21  ;;  %v422_v31 = vsel %vm254_vm0, %v404_v27, 0.0 }
  0xd1   : > { %v2383_v29 = vpop.eup %2023  ;;  %v405_v33 = vmul.f32 %v2381_v25, %v2381_v25 }
  0xd2   : > { %v406_v30 = vmul.f32 %v2383_v29, %v2383_v29 }
  0xd3   : > { %v425_v32 = vsel %vm254_vm0, %v405_v33, 0.0 }
  0xd4   : > { %423 = vadd.xlane.f32.xlu1 %v422_v31  ;;  %426 = vadd.xlane.f32.xlu0 %v425_v32  ;;  %v428_v35 = vsel %vm254_vm0, %v406_v30, 0.0 }
  0xd8   : > { %429 = vadd.xlane.f32.xlu1 %v428_v35 }
 0x145   : > { %v361_v36 = vpop.xlane.xlu0 %360 }
 0x146   : > { %2025 = vrsqrt.f32 %v361_v36 }
 0x149   : > { %v364_v38 = vpop.xlane.xlu1 %363  ;;  %v367_v39 = vpop.xlane.xlu0 %366 }
 0x14a   : > { %2027 = vrsqrt.f32 %v364_v38 }
 0x14d   : > { %v370_v40 = vpop.xlane.xlu1 %369  ;;  %v409_v41 = vpop.xlane.xlu0 %408 }
 0x14e   : > { %2029 = vrsqrt.f32 %v409_v41 }
 0x14f   : > { %2031 = vrsqrt.f32 %v367_v39  ;;  %v2454_v39 = vsub.s32 1, %v2393_v45 }
 0x150   : > { %v2026_v47 = vpop.eup %2025 }
 0x151   : > { %v412_v43 = vpop.xlane.xlu1 %411  ;;  %v373_v44 = vpop.xlane.xlu0 %372  ;;  %v2396_v49 = vmul.f32 %v2026_v47, %v2304_v24 }
 0x152   : > { %2033 = vrsqrt.f32 %v412_v43 }
 0x153   : > { %2035 = vrsqrt.f32 %v370_v40  ;;  %v450_v24 = vrot.slane %v2396_v49, %v2399_v50 }
 0x154   : > { %v2028_v54 = vpop.eup %2027 }
 0x155   : > { %v415_v48 = vpop.xlane.xlu1 %414  ;;  %v376_v52 = vpop.xlane.xlu0 %375  ;;  %v2402_v56 = vmul.f32 %v2028_v54, %v2315_v34 }
 0x156   : > { %2037 = vrsqrt.f32 %v415_v48 }
 0x157   : > { %2039 = vrsqrt.f32 %v373_v44 }
 0x158   : > { %v2030_v55 = vpop.eup %2029 }
 0x159   : > { %v418_v58 = vpop.xlane.xlu1 %417  ;;  %v379_v59 = vpop.xlane.xlu0 %378  ;;  %v2405_v1 = vmul.f32 %v2030_v55, %v2327_v46  ;;  %v454_v46 = vrot.slane %v2402_v56, %v2399_v50  ;;  %v795_v55 = vrot.slane %v2396_v49, %v2454_v39 }
 0x15a   : > { %v2032_v63 = vpop.eup %2031  ;;  %2041 = vrsqrt.f32 %v418_v58 }
 0x15b   : > { %2043 = vrsqrt.f32 %v376_v52  ;;  %v479_v4 = vmul.f32 %v450_v24, %v2405_v1  ;;  %v2411_v53 = vmul.f32 %v2032_v63, %v2306_v28  ;;  %v2475_v52 = vsub.s32 3, %v2393_v45 }
 0x15c   : > { %v2034_v3 = vpop.eup %2033  ;;  %2045 = vrsqrt.f32 %v379_v59 }
 0x15d   : > { %v421_v34 = vpop.xlane.xlu1 %420  ;;  %v382_v57 = vpop.xlane.xlu0 %381  ;;  %v2414_v5 = vmul.f32 %v2034_v3, %v2329_v51  ;;  %v487_v7 = vsel %vm254_vm0, %v479_v4, 0.0  ;;  %v458_v62 = vrot.slane %v2411_v53, %v2399_v50  ;;  %v824_v4 = vmul.f32 %v795_v55, %v2405_v1 }
 0x15e   : > { %v2036_v6 = vpop.eup %2035  ;;  %2047 = vrsqrt.f32 %v421_v34  ;;  %488 = vadd.xlane.f32.xlu0 %v487_v7 }
 0x15f   : > { %v480_v0 = vmul.f32 %v454_v46, %v2414_v5  ;;  %2049 = vrsqrt.f32 %v382_v57  ;;  %v2421_v28 = vmul.f32 %v2036_v6, %v2317_v37  ;;  %v1467_v46 = vrot.slane %v2396_v49, %v2475_v52 }
 0x160   : > { %v2038_v9 = vpop.eup %2037  ;;  %v799_v6 = vrot.slane %v2402_v56, %v2454_v39 }
 0x161   : > { %v424_v10 = vpop.xlane.xlu1 %423  ;;  %v427_v15 = vpop.xlane.xlu0 %426  ;;  %v490_v51 = vsel %vm254_vm0, %v480_v0, 0.0  ;;  %v2425_v61 = vmul.f32 %v2038_v9, %v2341_v2  ;;  %v462_v2 = vrot.slane %v2421_v28, %v2399_v50  ;;  %v1496_v9 = vmul.f32 %v1467_v46, %v2405_v1 }
 0x162   : > { %v2040_v16 = vpop.eup %2039  ;;  %2051 = vrsqrt.f32 %v424_v10  ;;  %491 = vadd.xlane.f32.xlu1 %v490_v51  ;;  %v832_v10 = vsel %vm254_vm0, %v824_v4, 0.0 }
 0x163   : > { %2053 = vrsqrt.f32 %v427_v15  ;;  %v481_v12 = vmul.f32 %v458_v62, %v2425_v61  ;;  %v2431_v37 = vmul.f32 %v2040_v16, %v2339_v60  ;;  %v825_v15 = vmul.f32 %v799_v6, %v2414_v5 }
 0x164   : > { %v2042_v13 = vpop.eup %2041  ;;  %v1504_v16 = vsel %vm254_vm0, %v1496_v9, 0.0 }
 0x165   : > { %v430_v20 = vpop.xlane.xlu1 %429  ;;  %v493_v22 = vsel %vm254_vm0, %v481_v12, 0.0  ;;  %v2435_v17 = vmul.f32 %v2042_v13, %v2353_v11  ;;  %v2044_v26 = vpop.eup %2043  ;;  %v466_v11 = vrot.slane %v2431_v37, %v2399_v50  ;;  %v1483_v51 = vrot.slane %v2431_v37, %v2475_v52 }
 0x166   : > { %2055 = vrsqrt.f32 %v430_v20  ;;  %494 = vadd.xlane.f32.xlu0 %v493_v22  ;;  %v2046_v27 = vpop.eup %2045  ;;  %v2441_v33 = vmul.f32 %v2044_v26, %v2351_v8  ;;  %v2457_v8 = vsub.s32 2, %v2393_v45  ;;  %v835_v13 = vsel %vm254_vm0, %v825_v15, 0.0 }
 0x167   : > { %v482_v21 = vmul.f32 %v462_v2, %v2435_v17  ;;  %v2450_v35 = vmul.f32 %v2046_v27, %v2361_v18  ;;  %v811_v46 = vrot.slane %v2431_v37, %v2454_v39 }
 0x168   : > { %v2048_v31 = vpop.eup %2047  ;;  %v470_v18 = vrot.slane %v2441_v33, %v2399_v50  ;;  %v1131_v62 = vrot.slane %v2396_v49, %v2457_v8  ;;  %v1151_v22 = vrot.slane %v2441_v33, %v2457_v8  ;;  %v1135_v2 = vrot.slane %v2402_v56, %v2457_v8 }
 0x169   : > { %v496_v60 = vsel %vm254_vm0, %v482_v21, 0.0  ;;  %v2445_v30 = vmul.f32 %v2048_v31, %v2363_v19  ;;  %v2050_v32 = vpop.eup %2049  ;;  %v474_v47 = vrot.slane %v2450_v35, %v2399_v50  ;;  %v1155_v48 = vrot.slane %v2450_v35, %v2457_v8 }
 0x16a   : > { %497 = vadd.xlane.f32.xlu1 %v496_v60  ;;  %v2460_v19 = vmul.f32 %v2050_v32, %v2371_v23  ;;  %v1160_v20 = vmul.f32 %v1131_v62, %v2405_v1  ;;  %v1161_v21 = vmul.f32 %v1135_v2, %v2414_v5  ;;  %v819_v1 = vrot.slane %v2450_v35, %v2454_v39 }
 0x16b   : > { %v483_v36 = vmul.f32 %v466_v11, %v2445_v30  ;;  %v1500_v12 = vmul.f32 %v1483_v51, %v2445_v30  ;;  %v1471_v31 = vrot.slane %v2402_v56, %v2475_v52  ;;  %v1147_v9 = vrot.slane %v2431_v37, %v2457_v8 }
 0x16c   : > { %v2052_v38 = vpop.eup %2051  ;;  %v478_v63 = vrot.slane %v2460_v19, %v2399_v50  ;;  %v823_v24 = vrot.slane %v2460_v19, %v2454_v39  ;;  %v1495_v34 = vrot.slane %v2460_v19, %v2475_v52  ;;  %v1168_v27 = vsel %vm254_vm0, %v1160_v20, 0.0 }
 0x16d   : > { %v2054_v40 = vpop.eup %2053  ;;  %v499_v41 = vsel %vm254_vm0, %v483_v36, 0.0  ;;  %v2464_v43 = vmul.f32 %v2052_v38, %v2373_v14  ;;  %v1516_v26 = vsel %vm254_vm0, %v1500_v12, 0.0  ;;  %v1171_v32 = vsel %vm254_vm0, %v1161_v21, 0.0 }
 0x16e   : > { %500 = vadd.xlane.f32.xlu0 %v499_v41  ;;  %v445_v44 = vmul.f32 %v2054_v40, %v2381_v25  ;;  %v1497_v36 = vmul.f32 %v1471_v31, %v2414_v5  ;;  %v1491_v38 = vrot.slane %v2450_v35, %v2475_v52  ;;  %v803_v40 = vrot.slane %v2411_v53, %v2454_v39 }
 0x16f   : > { %v484_v23 = vmul.f32 %v470_v18, %v2464_v43  ;;  %v1165_v49 = vmul.f32 %v1151_v22, %v2464_v43  ;;  %v1139_v5 = vrot.slane %v2411_v53, %v2457_v8  ;;  %v1487_v62 = vrot.slane %v2441_v33, %v2475_v52 }
 0x170   : > { %v2056_v54 = vpop.eup %2055  ;;  %v485_v14 = vmul.f32 %v474_v47, %v445_v44  ;;  %v2479_v58 = vmul.f32 %v1155_v48, %v445_v44  ;;  %v830_v11 = vmul.f32 %v819_v1, %v445_v44  ;;  %v1502_v18 = vmul.f32 %v1491_v38, %v445_v44 }
 0x171   : > { %v502_v25 = vsel %vm254_vm0, %v484_v23, 0.0  ;;  %v446_v59 = vmul.f32 %v2056_v54, %v2383_v29  ;;  %v1183_v60 = vsel %vm254_vm0, %v1165_v49, 0.0  ;;  %v1507_v56 = vsel %vm254_vm0, %v1497_v36, 0.0 }
 0x172   : > { %503 = vadd.xlane.f32.xlu1 %v502_v25  ;;  %v505_v3 = vsel %vm254_vm0, %v485_v14, 0.0  ;;  %v850_v41 = vsel %vm254_vm0, %v830_v11, 0.0  ;;  %v826_v47 = vmul.f32 %v803_v40, %v2425_v61  ;;  %v1159_v48 = vrot.slane %v2460_v19, %v2457_v8 }
 0x173   : > { %506 = vadd.xlane.f32.xlu0 %v505_v3  ;;  %v486_v57 = vmul.f32 %v478_v63, %v446_v59  ;;  %v2493_v29 = vmul.f32 %v823_v24, %v446_v59  ;;  %v2497_v7 = vmul.f32 %v1495_v34, %v446_v59  ;;  %v1522_v35 = vsel %vm254_vm0, %v1502_v18, 0.0 }
 0x174   : > { %v1167_v23 = vmul.f32 %v1159_v48, %v446_v59  ;;  %v838_v54 = vsel %vm254_vm0, %v826_v47, 0.0  ;;  %v1162_v44 = vmul.f32 %v1139_v5, %v2425_v61  ;;  %v1475_v14 = vrot.slane %v2411_v53, %v2475_v52 }
 0x175   : > { %v508_v0 = vsel %vm254_vm0, %v486_v57, 0.0  ;;  %v807_v59 = vrot.slane %v2421_v28, %v2454_v39  ;;  %v1143_v3 = vrot.slane %v2421_v28, %v2457_v8  ;;  %v1501_v37 = vmul.f32 %v1487_v62, %v2464_v43 }
 0x176   : > { %509 = vadd.xlane.f32.xlu1 %v508_v0  ;;  %v1189_v55 = vsel %vm254_vm0, %v1167_v23, 0.0  ;;  %v1174_v19 = vsel %vm254_vm0, %v1162_v44, 0.0  ;;  %v1498_v25 = vmul.f32 %v1475_v14, %v2425_v61  ;;  %v1479_v61 = vrot.slane %v2421_v28, %v2475_v52 }
 0x177   : > { %833 = vadd.xlane.f32.xlu0 %v832_v10  ;;  %v827_v24 = vmul.f32 %v807_v59, %v2435_v17  ;;  %v1163_v4 = vmul.f32 %v1143_v3, %v2435_v17  ;;  %v828_v0 = vmul.f32 %v811_v46, %v2445_v30  ;;  %v1164_v28 = vmul.f32 %v1147_v9, %v2445_v30 }
 0x178   : > { %v1510_v63 = vsel %vm254_vm0, %v1498_v25, 0.0  ;;  %v1499_v57 = vmul.f32 %v1479_v61, %v2435_v17  ;;  %v815_v17 = vrot.slane %v2441_v33, %v2454_v39  ;;  %v1519_v12 = vsel %vm254_vm0, %v1501_v37, 0.0 }
 0x179   : > { %v841_v53 = vsel %vm254_vm0, %v827_v24, 0.0  ;;  %v1177_v34 = vsel %vm254_vm0, %v1163_v4, 0.0  ;;  %v844_v10 = vsel %vm254_vm0, %v828_v0, 0.0  ;;  %v1180_v15 = vsel %vm254_vm0, %v1164_v28, 0.0 }
 0x17a   : > { %1505 = vadd.xlane.f32.xlu1 %v1504_v16  ;;  %v1513_v6 = vsel %vm254_vm0, %v1499_v57, 0.0  ;;  %v829_v51 = vmul.f32 %v815_v17, %v2464_v43  ;;  %v1186_v30 = vsel %vm254_vm0, %v2479_v58, 0.0  ;;  %v1525_v20 = vsel %vm254_vm0, %v2497_v7, 0.0 }
 0x17b   : > { %836 = vadd.xlane.f32.xlu0 %v835_v13  ;;  %v853_v13 = vsel %vm254_vm0, %v2493_v29, 0.0  ;;  %v536_v7 = vand.u32 127, %v447_v42 }
 0x17c   : > { %v847_v16 = vsel %vm254_vm0, %v829_v51, 0.0 }
 0x17e   : > { %1517 = vadd.xlane.f32.xlu1 %v1516_v26 }
 0x17f   : > { %1169 = vadd.xlane.f32.xlu0 %v1168_v27 }
 0x182   : > { %1184 = vadd.xlane.f32.xlu1 %v1183_v60 }
 0x183   : > { %1172 = vadd.xlane.f32.xlu0 %v1171_v32 }
 0x186   : > { %851 = vadd.xlane.f32.xlu1 %v850_v41 }
 0x187   : > { %1508 = vadd.xlane.f32.xlu0 %v1507_v56  ;;  %v2588_v56 = vsub.s32 %v536_v7, %v2393_v45 }
 0x18a   : > { %1523 = vadd.xlane.f32.xlu1 %v1522_v35 }
 0x18b   : > { %839 = vadd.xlane.f32.xlu0 %v838_v54 }
 0x18e   : > { %1190 = vadd.xlane.f32.xlu1 %v1189_v55 }
 0x18f   : > { %1175 = vadd.xlane.f32.xlu0 %v1174_v19 }
 0x193   : > { %1511 = vadd.xlane.f32.xlu0 %v1510_v63 }
 0x197   : > { %842 = vadd.xlane.f32.xlu0 %v841_v53 }
 0x19b   : > { %1178 = vadd.xlane.f32.xlu0 %v1177_v34 }
 0x19f   : > { %1514 = vadd.xlane.f32.xlu0 %v1513_v6 }
 0x1a3   : > { %845 = vadd.xlane.f32.xlu0 %v844_v10 }
 0x1a7   : > { %1181 = vadd.xlane.f32.xlu0 %v1180_v15 }
 0x1ab   : > { %848 = vadd.xlane.f32.xlu0 %v847_v16  ;;  %v2153_v16 = vmov 0  }
 0x1ac   : > { %1992 = vset.pattern.permute.xlu0 %v2153_v16  ;;  %1991 = vset.pattern.permute.xlu1 %v2153_v16 }
 0x1af   : > { %1520 = vadd.xlane.f32.xlu0 %v1519_v12 }
 0x1b3   : > { %1187 = vadd.xlane.f32.xlu0 %v1186_v30 }
 0x1b7   : > { %854 = vadd.xlane.f32.xlu0 %v853_v13 }
 0x1bb   : > { %1526 = vadd.xlane.f32.xlu0 %v1525_v20 }
 0x1eb   : > { %v489_v33 = vpop.xlane.xlu0 %488 }
 0x1ec   : > { %v511_v43 = vmul.f32 1.442695, %v489_v33 }
 0x1ee   : > { %2057 = vpow2.f32 %v511_v43 }
 0x1ef   : > { %v492_v22 = vpop.xlane.xlu1 %491 }
 0x1f0   : > { %v513_v26 = vmul.f32 1.442695, %v492_v22 }
 0x1f2   : > { %2059 = vpow2.f32 %v513_v26 }
 0x1f3   : > { %v495_v2 = vpop.xlane.xlu0 %494 }
 0x1f4   : > { %v515_v49 = vmul.f32 1.442695, %v495_v2 }
 0x1f6   : > { %2061 = vpow2.f32 %v515_v49 }
 0x1f7   : > { %v498_v27 = vpop.xlane.xlu1 %497 }
 0x1f8   : > { %v517_v21 = vmul.f32 1.442695, %v498_v27  ;;  %v2581_v32 = vpop.eup %2057 }
 0x1f9   : > { %v540_v23 = vrot.slane %v2581_v32, %v2588_v56 }
 0x1fa   : > { %2063 = vpow2.f32 %v517_v21 }
 0x1fb   : > { %v501_v58 = vpop.xlane.xlu0 %500 }
 0x1fc   : > { %v519_v1 = vmul.f32 1.442695, %v501_v58  ;;  %v2583_v38 = vpop.eup %2059 }
 0x1fd   : > { %v544_v42 = vrot.slane %v2583_v38, %v2588_v56 }
 0x1fe   : > { %2065 = vpow2.f32 %v519_v1 }
 0x1ff   : > { %v504_v29 = vpop.xlane.xlu1 %503  ;;  %v570_v14 = vsel %vm569_vm1, %v544_v42, %v540_v23 }
 0x200   : > { %v521_v31 = vmul.f32 1.442695, %v504_v29  ;;  %v507_v60 = vpop.xlane.xlu0 %506  ;;  %v2585_v18 = vpop.eup %2061 }
 0x201   : > { %v523_v11 = vmul.f32 1.442695, %v507_v60  ;;  %v548_v5 = vrot.slane %v2585_v18, %v2588_v56 }
 0x202   : > { %2067 = vpow2.f32 %v521_v31 }
 0x203   : > { %2069 = vpow2.f32 %v523_v11  ;;  %v510_v36 = vpop.xlane.xlu1 %509  ;;  %v572_v25 = vsel %vm571_vm2, %v548_v5, %v570_v14 }
 0x204   : > { %v525_v40 = vmul.f32 1.442695, %v510_v36  ;;  %v834_v41 = vpop.xlane.xlu0 %833  ;;  %v2590_v47 = vpop.eup %2063 }
 0x205   : > { %v552_v54 = vrot.slane %v2590_v47, %v2588_v56  ;;  %v856_v30 = vmul.f32 1.442695, %v834_v41 }
 0x206   : > { %2071 = vpow2.f32 %v525_v40 }
 0x207   : > { %v574_v24 = vsel %vm573_vm3, %v552_v54, %v572_v25  ;;  %v1506_v28 = vpop.xlane.xlu1 %1505  ;;  %2073 = vpow2.f32 %v856_v30 }
 0x208   : > { %v2594_v48 = vpop.eup %2065  ;;  %v837_v35 = vpop.xlane.xlu0 %836  ;;  %v1528_v20 = vmul.f32 1.442695, %v1506_v28 }
 0x209   : > { %v556_v44 = vrot.slane %v2594_v48, %v2588_v56  ;;  %v858_v33 = vmul.f32 1.442695, %v837_v35 }
 0x20a   : > { %2075 = vpow2.f32 %v1528_v20 }
 0x20b   : > { %v576_v53 = vsel %vm575_vm4, %v556_v44, %v574_v24  ;;  %v1518_v51 = vpop.xlane.xlu1 %1517  ;;  %2077 = vpow2.f32 %v858_v33 }
 0x20c   : > { %v2605_v55 = vpop.eup %2067  ;;  %v1170_v19 = vpop.xlane.xlu0 %1169  ;;  %v1536_v2 = vmul.f32 1.442695, %v1518_v51 }
 0x20d   : > { %v2608_v59 = vpop.eup %2069  ;;  %v560_v63 = vrot.slane %v2605_v55, %v2588_v56  ;;  %v1192_v43 = vmul.f32 1.442695, %v1170_v19 }
 0x20e   : > { %v564_v3 = vrot.slane %v2608_v59, %v2588_v56  ;;  %2079 = vpow2.f32 %v1536_v2 }
 0x20f   : > { %v578_v4 = vsel %vm577_vm5, %v560_v63, %v576_v53  ;;  %v1185_v37 = vpop.xlane.xlu1 %1184  ;;  %2081 = vpow2.f32 %v1192_v43 }
 0x210   : > { %v2617_v61 = vpop.eup %2071  ;;  %v1173_v34 = vpop.xlane.xlu0 %1172  ;;  %v580_v46 = vsel %vm579_vm6, %v564_v3, %v578_v4  ;;  %v1202_v44 = vmul.f32 1.442695, %v1185_v37 }
 0x211   : > { %v568_v57 = vrot.slane %v2617_v61, %v2588_v56  ;;  %v1194_v49 = vmul.f32 1.442695, %v1173_v34  ;;  %v2624_v41 = vpop.eup %2073 }
 0x212   : > { %v883_v43 = vrot.slane %v2624_v41, %v2588_v56 }
 0x213   : > { %v582_v6 = vsel %vm581_vm7, %v568_v57, %v580_v46  ;;  %v852_v22 = vpop.xlane.xlu1 %851  ;;  %2083 = vpow2.f32 %v1194_v49 }
 0x214   : > { %v1509_v0 = vpop.xlane.xlu0 %1508  ;;  %v585_v9 = vsel %vm584_vm8, %v582_v6, 0.0  ;;  %v2626_v35 = vpop.eup %2075  ;;  %v868_v4 = vmul.f32 1.442695, %v852_v22 }
 0x215   : > { %586 = vadd.xlane.f32.xlu0 %v585_v9  ;;  %v1530_v27 = vmul.f32 1.442695, %v1509_v0  ;;  %v2628_v54 = vpop.eup %2077 }
 0x216   : > { %v887_v20 = vrot.slane %v2628_v54, %v2588_v56 }
 0x217   : > { %v1524_v58 = vpop.xlane.xlu1 %1523  ;;  %2085 = vpow2.f32 %v1530_v27 }
 0x218   : > { %v840_v10 = vpop.xlane.xlu0 %839  ;;  %v2630_v19 = vpop.eup %2079 }
 0x219   : > { %v860_v21 = vmul.f32 1.442695, %v840_v10  ;;  %v2632_v63 = vpop.eup %2081  ;;  %v1540_v10 = vmul.f32 1.442695, %v1524_v58  ;;  %v1555_v58 = vrot.slane %v2626_v35, %v2588_v56 }
 0x21b   : > { %2087 = vpow2.f32 %v860_v21  ;;  %v1191_v42 = vpop.xlane.xlu1 %1190 }
 0x21c   : > { %v1176_v17 = vpop.xlane.xlu0 %1175  ;;  %v1206_v25 = vmul.f32 1.442695, %v1191_v42 }
 0x21d   : > { %v1196_v1 = vmul.f32 1.442695, %v1176_v17  ;;  %v2634_v3 = vpop.eup %2083 }
 0x21f   : > { %2089 = vpow2.f32 %v1196_v1 }
 0x220   : > { %v1512_v15 = vpop.xlane.xlu0 %1511 }
 0x221   : > { %v1532_v31 = vmul.f32 1.442695, %v1512_v15  ;;  %v2636_v53 = vpop.eup %2085  ;;  %v1223_v15 = vrot.slane %v2634_v3, %v2588_v56 }
 0x222   : > { %v1559_v1 = vrot.slane %v2636_v53, %v2588_v56 }
 0x223   : > { %2091 = vpow2.f32 %v1532_v31 }
 0x224   : > { %v843_v62 = vpop.xlane.xlu0 %842 }
 0x225   : > { %v862_v11 = vmul.f32 1.442695, %v843_v62  ;;  %v2638_v57 = vpop.eup %2087 }
 0x228   : > { %v1179_v12 = vpop.xlane.xlu0 %1178 }
 0x229   : > { %v1198_v60 = vmul.f32 1.442695, %v1179_v12  ;;  %v2640_v6 = vpop.eup %2089  ;;  %v1219_v12 = vrot.slane %v2632_v63, %v2588_v56 }
 0x22a   : > { %v1227_v16 = vrot.slane %v2640_v6, %v2588_v56 }
 0x22b   : > { %2093 = vpow2.f32 %v1198_v60  ;;  %v1248_v27 = vsel %vm569_vm1, %v1223_v15, %v1219_v12 }
 0x22c   : > { %v1515_v13 = vpop.xlane.xlu0 %1514  ;;  %v1249_v31 = vsel %vm571_vm2, %v1227_v16, %v1248_v27 }
 0x22d   : > { %v1534_v40 = vmul.f32 1.442695, %v1515_v13  ;;  %v2642_v0 = vpop.eup %2091 }
 0x230   : > { %v846_v26 = vpop.xlane.xlu0 %845 }
 0x231   : > { %v864_v5 = vmul.f32 1.442695, %v846_v26  ;;  %v891_v26 = vrot.slane %v2638_v57, %v2588_v56 }
 0x234   : > { %v1182_v29 = vpop.xlane.xlu0 %1181 }
 0x235   : > { %v1200_v7 = vmul.f32 1.442695, %v1182_v29  ;;  %v2644_v9 = vpop.eup %2093 }
 0x236   : > { %v1231_v30 = vrot.slane %v2644_v9, %v2588_v56 }
 0x237   : > { %2095 = vpow2.f32 %v1200_v7  ;;  %v1563_v7 = vrot.slane %v2642_v0, %v2588_v56 }
 0x238   : > { %v849_v36 = vpop.xlane.xlu0 %848  ;;  %2097 = vpow2.f32 %v862_v11 }
 0x239   : > { %v866_v23 = vmul.f32 1.442695, %v849_v36  ;;  %2099 = vpow2.f32 %v1534_v40  ;;  %v1250_v36 = vsel %vm573_vm3, %v1231_v30, %v1249_v31 }
 0x23a   : > { %2101 = vpow2.f32 %v864_v5 }
 0x23b   : > { %2103 = vpow2.f32 %v866_v23 }
 0x23c   : > { %v1521_v14 = vpop.xlane.xlu0 %1520  ;;  %2105 = vpow2.f32 %v1202_v44  ;;  %v912_v44 = vsel %vm569_vm1, %v887_v20, %v883_v43  ;;  %v1571_v43 = vrot.slane %v2630_v19, %v2588_v56 }
 0x23d   : > { %v1538_v24 = vmul.f32 1.442695, %v1521_v14  ;;  %2107 = vpow2.f32 %v1206_v25 }
 0x23f   : > { %2109 = vpow2.f32 %v1538_v24  ;;  %v913_v24 = vsel %vm571_vm2, %v891_v26, %v912_v44 }
 0x240   : > { %v1188_v34 = vpop.xlane.xlu0 %1187 }
 0x241   : > { %v1204_v46 = vmul.f32 1.442695, %v1188_v34  ;;  %v2646_v17 = vpop.eup %2095 }
 0x242   : > { %v2650_v62 = vpop.eup %2097  ;;  %v1235_v33 = vrot.slane %v2646_v17, %v2588_v56 }
 0x243   : > { %2111 = vpow2.f32 %v1204_v46  ;;  %v2654_v37 = vpop.eup %2099  ;;  %v895_v29 = vrot.slane %v2650_v62, %v2588_v56 }
 0x244   : > { %2113 = vpow2.f32 %v868_v4  ;;  %v855_v28 = vpop.xlane.xlu0 %854  ;;  %v2660_v13 = vpop.eup %2101  ;;  %v1567_v42 = vrot.slane %v2654_v37, %v2588_v56  ;;  %v1251_v5 = vsel %vm575_vm4, %v1235_v33, %v1250_v36 }
 0x245   : > { %v870_v51 = vmul.f32 1.442695, %v855_v28  ;;  %v2666_v2 = vpop.eup %2103  ;;  %v899_v11 = vrot.slane %v2660_v13, %v2588_v56  ;;  %v914_v46 = vsel %vm573_vm3, %v895_v29, %v913_v24 }
 0x246   : > { %v2673_v21 = vpop.eup %2105  ;;  %v903_v23 = vrot.slane %v2666_v2, %v2588_v56 }
 0x247   : > { %2115 = vpow2.f32 %v870_v51  ;;  %v2682_v60 = vpop.eup %2107  ;;  %v1239_v25 = vrot.slane %v2673_v21, %v2588_v56  ;;  %v915_v51 = vsel %vm575_vm4, %v899_v11, %v914_v46  ;;  %v2745_v46 = vsub.s32 6, %v2393_v45 }
 0x248   : > { %2117 = vpow2.f32 %v1540_v10  ;;  %v1527_v22 = vpop.xlane.xlu0 %1526  ;;  %v1584_v10 = vsel %vm569_vm1, %v1559_v1, %v1555_v58  ;;  %v1247_v28 = vrot.slane %v2682_v60, %v2588_v56  ;;  %v916_v30 = vsel %vm577_vm5, %v903_v23, %v915_v51 }
 0x249   : > { %v1542_v49 = vmul.f32 1.442695, %v1527_v22  ;;  %v2689_v40 = vpop.eup %2109  ;;  %v1252_v15 = vsel %vm577_vm5, %v1239_v25, %v1251_v5  ;;  %v1585_v16 = vsel %vm571_vm2, %v1563_v7, %v1584_v10 }
 0x24a   : > { %v1575_v20 = vrot.slane %v2689_v40, %v2588_v56  ;;  %v1586_v33 = vsel %vm573_vm3, %v1567_v42, %v1585_v16 }
 0x24b   : > { %2119 = vpow2.f32 %v1542_v49  ;;  %v1587_v31 = vsel %vm575_vm4, %v1571_v43, %v1586_v33  ;;  %v2757_v43 = vsub.s32 4, %v2393_v45 }
 0x24c   : > { %v1588_v11 = vsel %vm577_vm5, %v1575_v20, %v1587_v31 }
 0x24d   : > { %v2697_v14 = vpop.eup %2111 }
 0x24e   : > { %v2702_v4 = vpop.eup %2113  ;;  %v1243_v34 = vrot.slane %v2697_v14, %v2588_v56 }
 0x24f   : > { %v907_v49 = vrot.slane %v2702_v4, %v2588_v56 }
 0x250   : > { %v1253_v12 = vsel %vm579_vm6, %v1243_v34, %v1252_v15 }
 0x251   : > { %v2718_v22 = vpop.eup %2115  ;;  %v1254_v26 = vsel %vm581_vm7, %v1247_v28, %v1253_v12  ;;  %v917_v29 = vsel %vm579_vm6, %v907_v49, %v916_v30 }
 0x252   : > { %v2725_v27 = vpop.eup %2117  ;;  %v1256_v58 = vsel %vm584_vm8, %v1254_v26, 0.0  ;;  %v911_v1 = vrot.slane %v2718_v22, %v2588_v56  ;;  %v2762_v26 = vsub.s32 5, %v2393_v45 }
 0x253   : > { %1257 = vadd.xlane.f32.xlu0 %v1256_v58  ;;  %v1579_v5 = vrot.slane %v2725_v27, %v2588_v56 }
 0x254   : > { %v918_v7 = vsel %vm581_vm7, %v911_v1, %v917_v29 }
 0x255   : > { %v2734_v36 = vpop.eup %2119  ;;  %v920_v42 = vsel %vm584_vm8, %v918_v7, 0.0  ;;  %v1589_v44 = vsel %vm579_vm6, %v1579_v5, %v1588_v11 }
 0x256   : > { %921 = vadd.xlane.f32.xlu1 %v920_v42  ;;  %v1583_v23 = vrot.slane %v2734_v36, %v2588_v56 }
 0x258   : > { %v1590_v25 = vsel %vm581_vm7, %v1583_v23, %v1589_v44 }
 0x259   : > { %v1592_v24 = vsel %vm584_vm8, %v1590_v25, 0.0 }
 0x25a   : > { %1593 = vadd.xlane.f32.xlu1 %v1592_v24 }
 0x2a2   : > { %v587_v34 = vpop.xlane.xlu0 %586 }
 0x2a3   : > { %2121 = vrcp.f32 %v587_v34 }
 0x2ad   : > { %v2122_v10 = vpop.eup %2121 }
 0x2ae   : > { %v601_v28 = vrot.slane %v2122_v10, %v2457_v8  ;;  %v593_v15 = vrot.slane %v2122_v10, %v2399_v50  ;;  %v617_v16 = vrot.slane %v2122_v10, %v2745_v46  ;;  %v597_v12 = vrot.slane %v2122_v10, %v2454_v39 }
 0x2af   : > { %v605_v33 = vrot.slane %v2122_v10, %v2475_v52 }
 0x2b0   : > { %v632_v51 = vmul.f32 %v2585_v18, %v601_v28  ;;  %v630_v56 = vmul.f32 %v2581_v32, %v593_v15  ;;  %v636_v30 = vmul.f32 %v2608_v59, %v617_v16  ;;  %v631_v20 = vmul.f32 %v2583_v38, %v597_v12 }
 0x2b1   : > { %v633_v18 = vmul.f32 %v2590_v47, %v605_v33  ;;  %v609_v32 = vrot.slane %v2122_v10, %v2757_v43  ;;  %v613_v59 = vrot.slane %v2122_v10, %v2762_v26  ;;  %v2767_v38 = vsub.s32 7, %v2393_v45 }
 0x2b2   : > { %650 = vperm.xlu0 %1992, %v632_v51   ;;  %640 = vperm.xlu1 %1991, %v630_v56  }
 0x2b3   : > { %v634_v49 = vmul.f32 %v2594_v48, %v609_v32  ;;  %v635_v58 = vmul.f32 %v2605_v55, %v613_v59  ;;  %v621_v1 = vrot.slane %v2122_v10, %v2767_v38 }
 0x2b5   : > { %v637_v47 = vmul.f32 %v2617_v61, %v621_v1 }
 0x2b6   : > { %670 = vperm.xlu0 %1992, %v636_v30   ;;  %645 = vperm.xlu1 %1991, %v631_v20  }
 0x2ba   : > { %655 = vperm.xlu1 %1991, %v633_v18  }
 0x2be   : > { %660 = vperm.xlu1 %1991, %v634_v49  }
 0x2c2   : > { %665 = vperm.xlu1 %1991, %v635_v58   ;;  %v185_v58 = vld [vmem:[%s2193_s16 + $0x4] sm:$0x3] }
 0x2c3   : > { %v2822_v1 = vunpack.c.l.bf16 %v185_v58 }
 0x2c6   : > { %675 = vperm.xlu1 %1991, %v637_v47   ;;  %v188_v47 = vld [vmem:[%s2193_s16 + $0xa] sm:$0x3] }
 0x2e0   : > { %v1258_v31 = vpop.xlane.xlu0 %1257 }
 0x2e3   : > { %v922_v29 = vpop.xlane.xlu1 %921 }
 0x2e4   : > { %2123 = vrcp.f32 %v922_v29 }
 0x2e5   : > { %2125 = vrcp.f32 %v1258_v31  ;;  %v2830_v31 = vunpack.c.l.bf16 %v188_v47 }
 0x2e7   : > { %v1594_v7 = vpop.xlane.xlu1 %1593 }
 0x2e8   : > { %2127 = vrcp.f32 %v1594_v7 }
 0x2ee   : > { %v2124_v48 = vpop.eup %2123 }
 0x2ef   : > { %v944_v11 = vrot.slane %v2124_v48, %v2757_v43  ;;  %v928_v45 = vrot.slane %v2124_v48, %v2399_v50  ;;  %v952_v5 = vrot.slane %v2124_v48, %v2745_v46  ;;  %v932_v61 = vrot.slane %v2124_v48, %v2454_v39  ;;  %v2126_v23 = vpop.eup %2125 }
 0x2f0   : > { %v936_v24 = vrot.slane %v2124_v48, %v2457_v8  ;;  %v1264_v34 = vrot.slane %v2126_v23, %v2399_v50  ;;  %v940_v28 = vrot.slane %v2124_v48, %v2475_v52  ;;  %v948_v51 = vrot.slane %v2124_v48, %v2762_v26 }
 0x2f1   : > { %v969_v42 = vmul.f32 %v2660_v13, %v944_v11  ;;  %v965_v55 = vmul.f32 %v2624_v41, %v928_v45  ;;  %v971_v44 = vmul.f32 %v2702_v4, %v952_v5  ;;  %v966_v25 = vmul.f32 %v2628_v54, %v932_v61 }
 0x2f2   : > { %v2128_v10 = vpop.eup %2127  ;;  %v967_v41 = vmul.f32 %v2638_v57, %v936_v24  ;;  %v1301_v13 = vmul.f32 %v2632_v63, %v1264_v34  ;;  %v968_v4 = vmul.f32 %v2650_v62, %v940_v28  ;;  %v1272_v56 = vrot.slane %v2126_v23, %v2457_v8  ;;  %v197_v24 = vld [vmem:[%s2193_s16 + $0x1c] sm:$0x3] }
 0x2f3   : > { %995 = vperm.xlu0 %1992, %v969_v42   ;;  %975 = vperm.xlu1 %1991, %v965_v55   ;;  %v1600_v15 = vrot.slane %v2128_v10, %v2399_v50  ;;  %v970_v57 = vmul.f32 %v2666_v2, %v948_v51  ;;  %v956_v16 = vrot.slane %v2124_v48, %v2767_v38  ;;  %v2845_v51 = vunpack.c.l.bf16 %v197_v24 }
 0x2f4   : > { %v1303_v63 = vmul.f32 %v2640_v6, %v1272_v56  ;;  %v1276_v50 = vrot.slane %v2126_v23, %v2475_v52  ;;  %v1268_v12 = vrot.slane %v2126_v23, %v2454_v39  ;;  %v1280_v30 = vrot.slane %v2126_v23, %v2757_v43 }
 0x2f5   : > { %v1637_v54 = vmul.f32 %v2626_v35, %v1600_v15  ;;  %v972_v62 = vmul.f32 %v2718_v22, %v956_v16  ;;  %v1604_v20 = vrot.slane %v2128_v10, %v2454_v39  ;;  %v1284_v33 = vrot.slane %v2126_v23, %v2762_v26 }
 0x2f6   : > { %v1304_v35 = vmul.f32 %v2644_v9, %v1276_v50  ;;  %v1302_v2 = vmul.f32 %v2634_v3, %v1268_v12  ;;  %v1305_v6 = vmul.f32 %v2646_v17, %v1280_v30  ;;  %v1608_v18 = vrot.slane %v2128_v10, %v2457_v8 }
 0x2f7   : > { %1005 = vperm.xlu0 %1992, %v971_v44   ;;  %980 = vperm.xlu1 %1991, %v966_v25   ;;  %v1638_v22 = vmul.f32 %v2636_v53, %v1604_v20  ;;  %v1306_v9 = vmul.f32 %v2673_v21, %v1284_v33  ;;  %v1288_v32 = vrot.slane %v2126_v23, %v2745_v46  ;;  %v206_v20 = vld [vmem:[%s2193_s16 + $0x2e] sm:$0x3] }
 0x2f8   : > { %v1639_v3 = vmul.f32 %v2642_v0, %v1608_v18  ;;  %v1612_v39 = vrot.slane %v2128_v10, %v2475_v52  ;;  %v1292_v49 = vrot.slane %v2126_v23, %v2767_v38  ;;  %v1616_v8 = vrot.slane %v2128_v10, %v2757_v43 }
 0x2f9   : > { %v1307_v17 = vmul.f32 %v2697_v14, %v1288_v32  ;;  %v1620_v52 = vrot.slane %v2128_v10, %v2762_v26  ;;  %v1624_v59 = vrot.slane %v2128_v10, %v2745_v46 }
 0x2fa   : > { %v1640_v53 = vmul.f32 %v2654_v37, %v1612_v39  ;;  %v1308_v21 = vmul.f32 %v2682_v60, %v1292_v49  ;;  %v1641_v0 = vmul.f32 %v2630_v19, %v1616_v8  ;;  %v1628_v60 = vrot.slane %v2128_v10, %v2767_v38  ;;  %v191_v19 = vld [vmem:[%s2193_s16 + $0x10] sm:$0x3] }
 0x2fb   : > { %985 = vperm.xlu1 %1991, %v967_v41   ;;  %1311 = vperm.xlu0 %1992, %v1301_v13   ;;  %v1642_v14 = vmul.f32 %v2689_v40, %v1620_v52  ;;  %v1643_v37 = vmul.f32 %v2725_v27, %v1624_v59  ;;  %v2824_v26 = vunpack.c.l.bf16 %v191_v19  ;;  %v203_v40 = vld [vmem:[%s2193_s16 + $0x28] sm:$0x3]  ;;  %v2854_v39 = vunpack.c.l.bf16 %v206_v20 }
 0x2fc   : > { %v1644_v43 = vmul.f32 %v2734_v36, %v1628_v60  ;;  %v2832_v7 = vunpack.c.l.bf16 %v203_v40  ;;  %v194_v36 = vld [vmem:[%s2193_s16 + $0x16] sm:$0x3] }
 0x2fd   : > { %v2839_v44 = vunpack.c.l.bf16 %v194_v36 }
 0x2ff   : > { %990 = vperm.xlu1 %1991, %v968_v4   ;;  %1647 = vperm.xlu0 %1992, %v1637_v54  }
 0x303   : > { %1000 = vperm.xlu1 %1991, %v970_v57   ;;  %1321 = vperm.xlu0 %1992, %v1303_v63   ;;  %v200_v57 = vld [vmem:[%s2193_s16 + $0x22] sm:$0x3] }
 0x307   : > { %1010 = vperm.xlu1 %1991, %v972_v62   ;;  %1326 = vperm.xlu0 %1992, %v1304_v35  }
 0x30b   : > { %1316 = vperm.xlu1 %1991, %v1302_v2   ;;  %1331 = vperm.xlu0 %1992, %v1305_v6   ;;  %v2850_v6 = vunpack.c.l.bf16 %v200_v57 }
 0x30f   : > { %1652 = vperm.xlu1 %1991, %v1638_v22   ;;  %1336 = vperm.xlu0 %1992, %v1306_v9  }
 0x313   : > { %1657 = vperm.xlu1 %1991, %v1639_v3   ;;  %1341 = vperm.xlu0 %1992, %v1307_v17  }
 0x317   : > { %1662 = vperm.xlu1 %1991, %v1640_v53   ;;  %1346 = vperm.xlu0 %1992, %v1308_v21  }
 0x31b   : > { %1667 = vperm.xlu1 %1991, %v1641_v0  }
 0x31f   : > { %1672 = vperm.xlu1 %1991, %v1642_v14  }
 0x323   : > { %1677 = vperm.xlu1 %1991, %v1643_v37  }
 0x327   : > { %1682 = vperm.xlu1 %1991, %v1644_v43  }
 0x331   : > { %v641_v29 = vpop.permute.xlu1 %640  ;;  %v651_v46 = vpop.permute.xlu0 %650 }
 0x332   : > { %v678_v27 = vmul.f32 %v641_v29, %v2822_v1  ;;  %v680_v38 = vmul.f32 %v651_v46, %v2824_v26 }
 0x334   : > { %v686_v48 = vsel %vm254_vm0, %v678_v27, 0.0  ;;  %v700_v11 = vsel %vm254_vm0, %v680_v38, 0.0 }
 0x335   : > { %v687_v45 = vrot.slane %v686_v48, 4  ;;  %v701_v42 = vrot.slane %v700_v11, 4  ;;  %v646_v55 = vpop.permute.xlu1 %645  ;;  %v671_v5 = vpop.permute.xlu0 %670 }
 0x336   : > { %v679_v61 = vmul.f32 %v646_v55, %v2830_v31  ;;  %v684_v23 = vmul.f32 %v671_v5, %v2832_v7 }
 0x337   : > { %v688_v25 = vadd.f32 %v687_v45, %v686_v48  ;;  %v702_v34 = vadd.f32 %v701_v42, %v700_v11 }
 0x338   : > { %v693_v10 = vsel %vm254_vm0, %v679_v61, 0.0  ;;  %v728_v41 = vsel %vm254_vm0, %v684_v23, 0.0 }
 0x339   : > { %v689_v13 = vrot.slane %v688_v25, 2  ;;  %v694_v28 = vrot.slane %v693_v10, 4  ;;  %v656_v15 = vpop.permute.xlu1 %655  ;;  %v729_v4 = vrot.slane %v728_v41, 4  ;;  %v703_v63 = vrot.slane %v702_v34, 2 }
 0x33a   : > { %v681_v54 = vmul.f32 %v656_v15, %v2839_v44 }
 0x33b   : > { %v695_v56 = vadd.f32 %v694_v28, %v693_v10  ;;  %v690_v50 = vadd.f32 %v689_v13, %v688_v25  ;;  %v730_v12 = vadd.f32 %v729_v4, %v728_v41  ;;  %v704_v22 = vadd.f32 %v703_v63, %v702_v34 }
 0x33c   : > { %v707_v16 = vsel %vm254_vm0, %v681_v54, 0.0 }
 0x33d   : > { %v696_v62 = vrot.slane %v695_v56, 2  ;;  %v661_v35 = vpop.permute.xlu1 %660  ;;  %v708_v30 = vrot.slane %v707_v16, 4  ;;  %v691_v32 = vrot.slane %v690_v50, 1  ;;  %v731_v49 = vrot.slane %v730_v12, 2 }
 0x33e   : > { %v682_v2 = vmul.f32 %v661_v35, %v2845_v51  ;;  %v705_v52 = vrot.slane %v704_v22, 1 }
 0x33f   : > { %v697_v33 = vadd.f32 %v696_v62, %v695_v56  ;;  %v709_v9 = vadd.f32 %v708_v30, %v707_v16  ;;  %v692_v60 = vadd.f32 %v691_v32, %v690_v50  ;;  %v732_v19 = vadd.f32 %v731_v49, %v730_v12 }
 0x340   : > { %v714_v18 = vsel %vm254_vm0, %v682_v2, 0.0  ;;  %v706_v38 = vadd.f32 %v705_v52, %v704_v22 }
 0x341   : > { %v698_v3 = vrot.slane %v697_v33, 1  ;;  %v666_v17 = vpop.permute.xlu1 %665  ;;  %v710_v53 = vrot.slane %v709_v9, 2  ;;  %v715_v21 = vrot.slane %v714_v18, 4  ;;  %v1933_v45 = vpack.c.bf16 %v692_v60, %v692_v60 }
 0x342   : > { %v683_v8 = vmul.f32 %v666_v17, %v2850_v6  ;;  %v733_v5 = vrot.slane %v732_v19, 1  ;;  %v1935_v10 = vpack.c.bf16 %v706_v38, %v706_v38 }
 0x343   : > { %v699_v0 = vadd.f32 %v698_v3, %v697_v33  ;;  %v711_v14 = vadd.f32 %v710_v53, %v709_v9  ;;  %v716_v59 = vadd.f32 %v715_v21, %v714_v18  ;;  %v774_v13 = vunpack.c.l.b16 %v1933_v45 }
 0x344   : > { %v721_v37 = vsel %vm254_vm0, %v683_v8, 0.0  ;;  %v734_v4 = vadd.f32 %v733_v5, %v732_v19  ;;  %v776_v50 = vunpack.c.l.b16 %v1935_v10 }
 0x345   : > { %v722_v43 = vrot.slane %v721_v37, 4  ;;  %v676_v58 = vpop.permute.xlu1 %675  ;;  %v712_v47 = vrot.slane %v711_v14, 1  ;;  %v717_v40 = vrot.slane %v716_v59, 2  ;;  %v1934_v46 = vpack.c.bf16 %v699_v0, %v699_v0 }
 0x346   : > { %v685_v29 = vmul.f32 %v676_v58, %v2854_v39  ;;  %v1939_v30 = vpack.c.bf16 %v734_v4, %v734_v4 }
 0x347   : > { %v723_v27 = vadd.f32 %v722_v43, %v721_v37  ;;  %v713_v36 = vadd.f32 %v712_v47, %v711_v14  ;;  %v718_v48 = vadd.f32 %v717_v40, %v716_v59  ;;  %v775_v23 = vunpack.c.l.b16 %v1934_v46 }
 0x348   : > { %v735_v11 = vsel %vm254_vm0, %v685_v29, 0.0  ;;  %v780_v3 = vunpack.c.l.b16 %v1939_v30 }
 0x349   : > { %v724_v42 = vrot.slane %v723_v27, 2  ;;  %v736_v55 = vrot.slane %v735_v11, 4  ;;  %v719_v61 = vrot.slane %v718_v48, 1  ;;  %v1936_v25 = vpack.c.bf16 %v713_v36, %v713_v36 }
 0x34a   : > { %v782_v56 = vsel %vm569_vm1, %v775_v23, %v774_v13 }
 0x34b   : > { %v725_v24 = vadd.f32 %v724_v42, %v723_v27  ;;  %v737_v34 = vadd.f32 %v736_v55, %v735_v11  ;;  %v720_v41 = vadd.f32 %v719_v61, %v718_v48  ;;  %v777_v57 = vunpack.c.l.b16 %v1936_v25 }
 0x34c   : > { %v783_v2 = vsel %vm571_vm2, %v776_v50, %v782_v56 }
 0x34d   : > { %v726_v28 = vrot.slane %v725_v24, 1  ;;  %v738_v15 = vrot.slane %v737_v34, 2  ;;  %v1937_v54 = vpack.c.bf16 %v720_v41, %v720_v41  ;;  %v784_v20 = vsel %vm573_vm3, %v777_v57, %v783_v2 }
 0x34f   : > { %v727_v63 = vadd.f32 %v726_v28, %v725_v24  ;;  %v739_v16 = vadd.f32 %v738_v15, %v737_v34  ;;  %v778_v62 = vunpack.c.l.b16 %v1937_v54 }
 0x351   : > { %v1938_v35 = vpack.c.bf16 %v727_v63, %v727_v63  ;;  %v740_v12 = vrot.slane %v739_v16, 1  ;;  %v785_v9 = vsel %vm575_vm4, %v778_v62, %v784_v20 }
 0x353   : > { %v779_v33 = vunpack.c.l.b16 %v1938_v35  ;;  %v741_v22 = vadd.f32 %v740_v12, %v739_v16 }
 0x355   : > { %v786_v18 = vsel %vm577_vm5, %v779_v33, %v785_v9  ;;  %v1940_v32 = vpack.c.bf16 %v741_v22, %v741_v22 }
 0x356   : > { %v787_v49 = vsel %vm579_vm6, %v780_v3, %v786_v18 }
 0x357   : > { %v781_v17 = vunpack.c.l.b16 %v1940_v32 }
 0x359   : > { %v788_v53 = vsel %vm581_vm7, %v781_v17, %v787_v49 }
 0x35a   : > { %v789_v21 = vpack.c.b16 %v788_v53, %v788_v53 }
 0x35c   : > { %791 = vst.msk [vmem:[%s2870_s22] sm:$0xf] %vm254_vm0, %v789_v21 }
 0x372   : > { %v976_v8 = vpop.permute.xlu1 %975  ;;  %v996_v0 = vpop.permute.xlu0 %995 }
 0x373   : > { %v1013_v52 = vmul.f32 %v976_v8, %v2822_v1  ;;  %v1017_v14 = vmul.f32 %v996_v0, %v2845_v51 }
 0x375   : > { %v1021_v59 = vsel %vm254_vm0, %v1013_v52, 0.0  ;;  %v1049_v37 = vsel %vm254_vm0, %v1017_v14, 0.0 }
 0x376   : > { %v1022_v60 = vrot.slane %v1021_v59, 4  ;;  %v1050_v43 = vrot.slane %v1049_v37, 4  ;;  %v981_v58 = vpop.permute.xlu1 %980  ;;  %v1006_v19 = vpop.permute.xlu0 %1005 }
 0x377   : > { %v1014_v47 = vmul.f32 %v981_v58, %v2830_v31  ;;  %v1019_v40 = vmul.f32 %v1006_v19, %v2832_v7 }
 0x378   : > { %v1023_v29 = vadd.f32 %v1022_v60, %v1021_v59  ;;  %v1051_v46 = vadd.f32 %v1050_v43, %v1049_v37 }
 0x379   : > { %v1028_v27 = vsel %vm254_vm0, %v1014_v47, 0.0  ;;  %v1063_v38 = vsel %vm254_vm0, %v1019_v40, 0.0 }
 0x37a   : > { %v1024_v36 = vrot.slane %v1023_v29, 2  ;;  %v1052_v48 = vrot.slane %v1051_v46, 2  ;;  %v1029_v11 = vrot.slane %v1028_v27, 4  ;;  %v1064_v45 = vrot.slane %v1063_v38, 4  ;;  %v986_v42 = vpop.permute.xlu1 %985  ;;  %v1312_v55 = vpop.permute.xlu0 %1311 }
 0x37b   : > { %v1015_v5 = vmul.f32 %v986_v42, %v2824_v26  ;;  %v1349_v61 = vmul.f32 %v1312_v55, %v2822_v1 }
 0x37c   : > { %v1025_v23 = vadd.f32 %v1024_v36, %v1023_v29  ;;  %v1053_v25 = vadd.f32 %v1052_v48, %v1051_v46  ;;  %v1030_v24 = vadd.f32 %v1029_v11, %v1028_v27  ;;  %v1065_v34 = vadd.f32 %v1064_v45, %v1063_v38 }
 0x37d   : > { %v1035_v10 = vsel %vm254_vm0, %v1015_v5, 0.0  ;;  %v1357_v41 = vsel %vm254_vm0, %v1349_v61, 0.0 }
 0x37e   : > { %v1026_v13 = vrot.slane %v1025_v23, 1  ;;  %v1031_v28 = vrot.slane %v1030_v24, 2  ;;  %v1066_v15 = vrot.slane %v1065_v34, 2  ;;  %v991_v4 = vpop.permute.xlu1 %990  ;;  %v1648_v54 = vpop.permute.xlu0 %1647  ;;  %v1036_v56 = vrot.slane %v1035_v10, 4 }
 0x37f   : > { %v1358_v57 = vrot.slane %v1357_v41, 4  ;;  %v1016_v63 = vmul.f32 %v991_v4, %v2839_v44  ;;  %v1054_v16 = vrot.slane %v1053_v25, 1  ;;  %v1685_v62 = vmul.f32 %v1648_v54, %v2822_v1 }
 0x380   : > { %v1032_v50 = vadd.f32 %v1031_v28, %v1030_v24  ;;  %v1067_v35 = vadd.f32 %v1066_v15, %v1065_v34  ;;  %v1037_v12 = vadd.f32 %v1036_v56, %v1035_v10  ;;  %v1027_v2 = vadd.f32 %v1026_v13, %v1025_v23 }
 0x381   : > { %v1042_v30 = vsel %vm254_vm0, %v1016_v63, 0.0  ;;  %v1359_v18 = vadd.f32 %v1358_v57, %v1357_v41  ;;  %v1055_v3 = vadd.f32 %v1054_v16, %v1053_v25  ;;  %v1693_v17 = vsel %vm254_vm0, %v1685_v62, 0.0 }
 0x382   : > { %v1033_v20 = vrot.slane %v1032_v50, 1  ;;  %v1001_v33 = vpop.permute.xlu1 %1000  ;;  %v1322_v22 = vpop.permute.xlu0 %1321  ;;  %v1038_v9 = vrot.slane %v1037_v12, 2  ;;  %v1043_v32 = vrot.slane %v1042_v30, 4  ;;  %v1068_v53 = vrot.slane %v1067_v35, 1 }
 0x383   : > { %v1941_v0 = vpack.c.bf16 %v1027_v2, %v1027_v2  ;;  %v1018_v1 = vmul.f32 %v1001_v33, %v2850_v6  ;;  %v1351_v52 = vmul.f32 %v1322_v22, %v2824_v26  ;;  %v1360_v37 = vrot.slane %v1359_v18, 2 }
 0x384   : > { %v1034_v49 = vadd.f32 %v1033_v20, %v1032_v50  ;;  %v1039_v21 = vadd.f32 %v1038_v9, %v1037_v12  ;;  %v1044_v8 = vadd.f32 %v1043_v32, %v1042_v30  ;;  %v1694_v43 = vrot.slane %v1693_v17, 4 }
 0x385   : > { %v1945_v19 = vpack.c.bf16 %v1055_v3, %v1055_v3  ;;  %v1056_v47 = vsel %vm254_vm0, %v1018_v1, 0.0  ;;  %v1371_v40 = vsel %vm254_vm0, %v1351_v52, 0.0  ;;  %v1069_v46 = vadd.f32 %v1068_v53, %v1067_v35 }
 0x386   : > { %v1011_v14 = vpop.permute.xlu1 %1010  ;;  %v1040_v59 = vrot.slane %v1039_v21, 1  ;;  %v1045_v60 = vrot.slane %v1044_v8, 2  ;;  %v1327_v58 = vpop.permute.xlu0 %1326  ;;  %v1942_v29 = vpack.c.bf16 %v1034_v49, %v1034_v49  ;;  %v1109_v36 = vunpack.c.l.b16 %v1941_v0 }
 0x387   : > { %v1057_v48 = vrot.slane %v1056_v47, 4  ;;  %v1372_v11 = vrot.slane %v1371_v40, 4  ;;  %v1020_v45 = vmul.f32 %v1011_v14, %v2854_v39  ;;  %v1361_v5 = vadd.f32 %v1360_v37, %v1359_v18 }
 0x388   : > { %v1041_v27 = vadd.f32 %v1040_v59, %v1039_v21  ;;  %v1046_v38 = vadd.f32 %v1045_v60, %v1044_v8  ;;  %v2896_v23 = vadd.f32 %v1694_v43, %v1693_v17  ;;  %v1352_v10 = vmul.f32 %v1327_v58, %v2839_v44 }
 0x389   : > { %v1058_v25 = vadd.f32 %v1057_v48, %v1056_v47  ;;  %v1373_v24 = vadd.f32 %v1372_v11, %v1371_v40  ;;  %v1070_v34 = vsel %vm254_vm0, %v1020_v45, 0.0  ;;  %v1113_v41 = vunpack.c.l.b16 %v1945_v19 }
 0x38a   : > { %v1317_v42 = vpop.permute.xlu1 %1316  ;;  %v1943_v55 = vpack.c.bf16 %v1041_v27, %v1041_v27  ;;  %v1047_v61 = vrot.slane %v1046_v38, 1  ;;  %v1110_v13 = vunpack.c.l.b16 %v1942_v29  ;;  %v1947_v28 = vpack.c.bf16 %v1069_v46, %v1069_v46  ;;  %v1332_v4 = vpop.permute.xlu0 %1331 }
 0x38b   : > { %v1059_v56 = vrot.slane %v1058_v25, 2  ;;  %v1071_v57 = vrot.slane %v1070_v34, 4  ;;  %v1378_v63 = vsel %vm254_vm0, %v1352_v10, 0.0  ;;  %v1362_v50 = vrot.slane %v1361_v5, 1 }
 0x38c   : > { %v1048_v15 = vadd.f32 %v1047_v61, %v1046_v38  ;;  %v1111_v54 = vunpack.c.l.b16 %v1943_v55  ;;  %v1374_v35 = vrot.slane %v1373_v24, 2  ;;  %v1379_v12 = vrot.slane %v1378_v63, 4 }
 0x38d   : > { %v1696_v30 = vrot.slane %v2896_v23, 2  ;;  %v1060_v2 = vadd.f32 %v1059_v56, %v1058_v25  ;;  %v1072_v20 = vadd.f32 %v1071_v57, %v1070_v34  ;;  %v1350_v33 = vmul.f32 %v1317_v42, %v2830_v31 }
 0x38e   : > { %v1653_v16 = vpop.permute.xlu1 %1652  ;;  %v1944_v62 = vpack.c.bf16 %v1048_v15, %v1048_v15  ;;  %v1117_v22 = vsel %vm569_vm1, %v1110_v13, %v1109_v36  ;;  %v1380_v18 = vadd.f32 %v1379_v12, %v1378_v63  ;;  %v1353_v32 = vmul.f32 %v1332_v4, %v2845_v51  ;;  %v1337_v14 = vpop.permute.xlu0 %1336 }
 0x38f   : > { %v1118_v3 = vsel %vm571_vm2, %v1111_v54, %v1117_v22  ;;  %v1061_v17 = vrot.slane %v1060_v2, 1  ;;  %v1073_v49 = vrot.slane %v1072_v20, 2  ;;  %v1364_v53 = vsel %vm254_vm0, %v1350_v33, 0.0 }
 0x390   : > { %v1112_v9 = vunpack.c.l.b16 %v1944_v62  ;;  %v1375_v8 = vadd.f32 %v1374_v35, %v1373_v24  ;;  %v1381_v0 = vrot.slane %v1380_v18, 2  ;;  %v1365_v1 = vrot.slane %v1364_v53, 4 }
 0x391   : > { %v1385_v52 = vsel %vm254_vm0, %v1353_v32, 0.0  ;;  %v1115_v59 = vunpack.c.l.b16 %v1947_v28  ;;  %v1062_v60 = vadd.f32 %v1061_v17, %v1060_v2  ;;  %v1074_v43 = vadd.f32 %v1073_v49, %v1072_v20 }
 0x392   : > { %v1658_v21 = vpop.permute.xlu1 %1657  ;;  %v1119_v37 = vsel %vm573_vm3, %v1112_v9, %v1118_v3  ;;  %v1382_v58 = vadd.f32 %v1381_v0, %v1380_v18  ;;  %v1366_v19 = vadd.f32 %v1365_v1, %v1364_v53  ;;  %v1386_v47 = vrot.slane %v1385_v52, 4 }
 0x393   : > { %v1686_v40 = vmul.f32 %v1653_v16, %v2830_v31  ;;  %v1363_v29 = vadd.f32 %v1362_v50, %v1361_v5  ;;  %v1946_v46 = vpack.c.bf16 %v1062_v60, %v1062_v60  ;;  %v1075_v27 = vrot.slane %v1074_v43, 1  ;;  %v1342_v5 = vpop.permute.xlu0 %1341 }
 0x394   : > { %v1354_v38 = vmul.f32 %v1337_v14, %v2850_v6  ;;  %v1376_v48 = vrot.slane %v1375_v8, 1  ;;  %v1367_v11 = vrot.slane %v1366_v19, 2  ;;  %v1387_v45 = vadd.f32 %v1386_v47, %v1385_v52 }
 0x395   : > { %v1700_v42 = vsel %vm254_vm0, %v1686_v40, 0.0  ;;  %v1114_v55 = vunpack.c.l.b16 %v1946_v46  ;;  %v1120_v61 = vsel %vm575_vm4, %v1113_v41, %v1119_v37  ;;  %v1076_v25 = vadd.f32 %v1075_v27, %v1074_v43 }
 0x396   : > { %v1663_v36 = vpop.permute.xlu1 %1662  ;;  %v1701_v24 = vrot.slane %v1700_v42, 4  ;;  %v1383_v34 = vrot.slane %v1382_v58, 1  ;;  %v1368_v10 = vadd.f32 %v1367_v11, %v1366_v19  ;;  %v1388_v13 = vrot.slane %v1387_v45, 2 }
 0x397   : > { %v1392_v31 = vsel %vm254_vm0, %v1354_v38, 0.0  ;;  %v1697_v28 = vadd.f32 %v1696_v30, %v2896_v23  ;;  %v1121_v15 = vsel %vm577_vm5, %v1114_v55, %v1120_v61  ;;  %v1948_v4 = vpack.c.bf16 %v1076_v25, %v1076_v25 }
 0x398   : > { %v1393_v54 = vrot.slane %v1392_v31, 4  ;;  %v1949_v57 = vpack.c.bf16 %v1363_v29, %v1363_v29  ;;  %v1369_v63 = vrot.slane %v1368_v10, 1  ;;  %v1389_v16 = vadd.f32 %v1388_v13, %v1387_v45 }
 0x399   : > { %v1702_v50 = vadd.f32 %v1701_v24, %v1700_v42  ;;  %v1377_v41 = vadd.f32 %v1376_v48, %v1375_v8  ;;  %v1116_v62 = vunpack.c.l.b16 %v1948_v4  ;;  %v1687_v12 = vmul.f32 %v1658_v21, %v2824_v26  ;;  %v1347_v8 = vpop.permute.xlu0 %1346 }
 0x39a   : > { %v1668_v56 = vpop.permute.xlu1 %1667  ;;  %v1394_v35 = vadd.f32 %v1393_v54, %v1392_v31  ;;  %v1122_v2 = vsel %vm579_vm6, %v1115_v59, %v1121_v15  ;;  %v1384_v20 = vadd.f32 %v1383_v34, %v1382_v58  ;;  %v1370_v33 = vadd.f32 %v1369_v63, %v1368_v10 }
 0x39b   : > { %v1355_v23 = vmul.f32 %v1342_v5, %v2832_v7  ;;  %v1123_v30 = vsel %vm581_vm7, %v1116_v62, %v1122_v2  ;;  %v1390_v22 = vrot.slane %v1389_v16, 1  ;;  %v1707_v18 = vsel %vm254_vm0, %v1687_v12, 0.0 }
 0x39c   : > { %v1395_v9 = vrot.slane %v1394_v35, 2  ;;  %v1124_v3 = vpack.c.b16 %v1123_v30, %v1123_v30  ;;  %v1950_v17 = vpack.c.bf16 %v1370_v33, %v1370_v33  ;;  %v1703_v49 = vrot.slane %v1702_v50, 2 }
 0x39d   : > { %v1708_v53 = vrot.slane %v1707_v18, 4  ;;  %v1698_v26 = vrot.slane %v1697_v28, 1  ;;  %v1951_v21 = vpack.c.bf16 %v1377_v41, %v1377_v41  ;;  %v1399_v0 = vsel %vm254_vm0, %v1355_v23, 0.0 }
 0x39e   : > { %v1673_v32 = vpop.permute.xlu1 %1672  ;;  %v1688_v1 = vmul.f32 %v1663_v36, %v2839_v44  ;;  %1911 = vst.msk [vmem:[%s2870_s22 + $0x4] sm:$0xf] %vm254_vm0, %v1124_v3  ;;  %v1446_v52 = vunpack.c.l.b16 %v1950_v17  ;;  %v1396_v14 = vadd.f32 %v1395_v9, %v1394_v35  ;;  %v1400_v37 = vrot.slane %v1399_v0, 4 }
 0x39f   : > { %v1709_v59 = vadd.f32 %v1708_v53, %v1707_v18  ;;  %v1952_v60 = vpack.c.bf16 %v1384_v20, %v1384_v20  ;;  %v1391_v43 = vadd.f32 %v1390_v22, %v1389_v16  ;;  %v1356_v19 = vmul.f32 %v1347_v8, %v2854_v39 }
 0x3a0   : > { %v1714_v58 = vsel %vm254_vm0, %v1688_v1, 0.0  ;;  %v1445_v47 = vunpack.c.l.b16 %v1949_v57  ;;  %v1704_v40 = vadd.f32 %v1703_v49, %v1702_v50  ;;  %v1401_v29 = vadd.f32 %v1400_v37, %v1399_v0 }
 0x3a1   : > { %v2927_v27 = vadd.f32 %v1698_v26, %v1697_v28  ;;  %v1710_v38 = vrot.slane %v1709_v59, 2  ;;  %v1715_v44 = vrot.slane %v1714_v58, 4  ;;  %v1397_v48 = vrot.slane %v1396_v14, 1 }
 0x3a2   : > { %v1678_v46 = vpop.permute.xlu1 %1677  ;;  %v1453_v36 = vsel %vm569_vm1, %v1446_v52, %v1445_v47  ;;  %v1402_v11 = vrot.slane %v1401_v29, 2  ;;  %v1406_v45 = vsel %vm254_vm0, %v1356_v19, 0.0  ;;  %v1447_v42 = vunpack.c.l.b16 %v1951_v21 }
 0x3a3   : > { %v1448_v55 = vunpack.c.l.b16 %v1952_v60  ;;  %v1953_v61 = vpack.c.bf16 %v1391_v43, %v1391_v43  ;;  %v1716_v25 = vadd.f32 %v1715_v44, %v1714_v58  ;;  %v1705_v24 = vrot.slane %v1704_v40, 1 }
 0x3a4   : > { %v1403_v34 = vadd.f32 %v1402_v11, %v1401_v29  ;;  %v1407_v10 = vrot.slane %v1406_v45, 4  ;;  %v1689_v13 = vmul.f32 %v1668_v56, %v2845_v51  ;;  %v1454_v31 = vsel %vm571_vm2, %v1447_v42, %v1453_v36 }
 0x3a5   : > { %v1711_v5 = vadd.f32 %v1710_v38, %v1709_v59  ;;  %v1717_v28 = vrot.slane %v1716_v25, 2  ;;  %v1690_v15 = vmul.f32 %v1673_v32, %v2850_v6  ;;  %v1398_v4 = vadd.f32 %v1397_v48, %v1396_v14 }
 0x3a6   : > { %v1404_v54 = vrot.slane %v1403_v34, 1  ;;  %v1408_v57 = vadd.f32 %v1407_v10, %v1406_v45  ;;  %v1721_v63 = vsel %vm254_vm0, %v1689_v13, 0.0  ;;  %v1683_v16 = vpop.permute.xlu1 %1682  ;;  %v1449_v50 = vunpack.c.l.b16 %v1953_v61 }
 0x3a7   : > { %v1718_v41 = vadd.f32 %v1717_v28, %v1716_v25  ;;  %v1722_v62 = vrot.slane %v1721_v63, 4  ;;  %v1728_v35 = vsel %vm254_vm0, %v1690_v15, 0.0  ;;  %v1455_v12 = vsel %vm573_vm3, %v1448_v55, %v1454_v31 }
 0x3a8   : > { %v1405_v51 = vadd.f32 %v1404_v54, %v1403_v34  ;;  %v1409_v56 = vrot.slane %v1408_v57, 2  ;;  %v1729_v2 = vrot.slane %v1728_v35, 4  ;;  %v1712_v20 = vrot.slane %v1711_v5, 1 }
 0x3a9   : > { %v1723_v33 = vadd.f32 %v1722_v62, %v1721_v63  ;;  %v1691_v6 = vmul.f32 %v1678_v46, %v2832_v7  ;;  %v1692_v23 = vmul.f32 %v1683_v16, %v2854_v39  ;;  %v1954_v30 = vpack.c.bf16 %v1398_v4, %v1398_v4 }
 0x3aa   : > { %v1719_v22 = vrot.slane %v1718_v41, 1  ;;  %v1410_v9 = vadd.f32 %v1409_v56, %v1408_v57  ;;  %v1730_v18 = vadd.f32 %v1729_v2, %v1728_v35  ;;  %v1955_v32 = vpack.c.bf16 %v1405_v51, %v1405_v51 }
 0x3ab   : > { %v1724_v3 = vrot.slane %v1723_v33, 2  ;;  %v1735_v17 = vsel %vm254_vm0, %v1691_v6, 0.0  ;;  %v1742_v49 = vsel %vm254_vm0, %v1692_v23, 0.0  ;;  %v1456_v53 = vsel %vm575_vm4, %v1449_v50, %v1455_v12 }
 0x3ac   : > { %v1706_v8 = vadd.f32 %v1705_v24, %v1704_v40  ;;  %v1411_v26 = vrot.slane %v1410_v9, 1  ;;  %v1731_v21 = vrot.slane %v1730_v18, 2  ;;  %v1713_v0 = vadd.f32 %v1712_v20, %v1711_v5 }
 0x3ad   : > { %v1725_v1 = vadd.f32 %v1724_v3, %v1723_v33  ;;  %v1736_v7 = vrot.slane %v1735_v17, 4  ;;  %v1743_v52 = vrot.slane %v1742_v49, 4  ;;  %v1450_v39 = vunpack.c.l.b16 %v1954_v30 }
 0x3ae   : > { %v1720_v14 = vadd.f32 %v1719_v22, %v1718_v41  ;;  %v1412_v59 = vadd.f32 %v1411_v26, %v1410_v9  ;;  %v1732_v37 = vadd.f32 %v1731_v21, %v1730_v18  ;;  %v1451_v60 = vunpack.c.l.b16 %v1955_v32 }
 0x3af   : > { %v1726_v43 = vrot.slane %v1725_v1, 1  ;;  %v1737_v58 = vadd.f32 %v1736_v7, %v1735_v17  ;;  %v1744_v19 = vadd.f32 %v1743_v52, %v1742_v49  ;;  %v1957_v47 = vpack.c.bf16 %v2927_v27, %v2927_v27 }
 0x3b0   : > { %v1958_v29 = vpack.c.bf16 %v1706_v8, %v1706_v8  ;;  %v1956_v46 = vpack.c.bf16 %v1412_v59, %v1412_v59  ;;  %v1733_v40 = vrot.slane %v1732_v37, 1  ;;  %v1959_v38 = vpack.c.bf16 %v1713_v0, %v1713_v0 }
 0x3b1   : > { %v1727_v44 = vadd.f32 %v1726_v43, %v1725_v1  ;;  %v1738_v36 = vrot.slane %v1737_v58, 2  ;;  %v1745_v48 = vrot.slane %v1744_v19, 2  ;;  %v1457_v11 = vsel %vm577_vm5, %v1450_v39, %v1456_v53 }
 0x3b2   : > { %v1960_v45 = vpack.c.bf16 %v1720_v14, %v1720_v14  ;;  %v1452_v42 = vunpack.c.l.b16 %v1956_v46  ;;  %v1734_v55 = vadd.f32 %v1733_v40, %v1732_v37  ;;  %v1458_v61 = vsel %vm579_vm6, %v1451_v60, %v1457_v11 }
 0x3b3   : > { %v1961_v25 = vpack.c.bf16 %v1727_v44, %v1727_v44  ;;  %v1739_v24 = vadd.f32 %v1738_v36, %v1737_v58  ;;  %v1746_v34 = vadd.f32 %v1745_v48, %v1744_v19  ;;  %v1782_v10 = vunpack.c.l.b16 %v1958_v29 }
 0x3b4   : > { %v1459_v27 = vsel %vm581_vm7, %v1452_v42, %v1458_v61  ;;  %v1962_v13 = vpack.c.bf16 %v1734_v55, %v1734_v55  ;;  %v1783_v31 = vunpack.c.l.b16 %v1959_v38  ;;  %v1781_v4 = vunpack.c.l.b16 %v1957_v47 }
 0x3b5   : > { %v1460_v5 = vpack.c.b16 %v1459_v27, %v1459_v27  ;;  %v1740_v28 = vrot.slane %v1739_v24, 1  ;;  %v1747_v15 = vrot.slane %v1746_v34, 1  ;;  %v1784_v54 = vunpack.c.l.b16 %v1960_v45 }
 0x3b6   : > { %v1785_v57 = vunpack.c.l.b16 %v1961_v25  ;;  %v1789_v50 = vsel %vm569_vm1, %v1782_v10, %v1781_v4  ;;  %v1786_v41 = vunpack.c.l.b16 %v1962_v13 }
 0x3b7   : > { %1920 = vst.msk [vmem:[%s2870_s22 + $0x8] sm:$0xf] %vm254_vm0, %v1460_v5  ;;  %v1741_v63 = vadd.f32 %v1740_v28, %v1739_v24  ;;  %v1748_v16 = vadd.f32 %v1747_v15, %v1746_v34  ;;  %v1790_v62 = vsel %vm571_vm2, %v1783_v31, %v1789_v50 }
 0x3b8   : > { %v1791_v51 = vsel %vm573_vm3, %v1784_v54, %v1790_v62 }
 0x3b9   : > { %v1963_v35 = vpack.c.bf16 %v1741_v63, %v1741_v63  ;;  %v1964_v12 = vpack.c.bf16 %v1748_v16, %v1748_v16  ;;  %v1792_v56 = vsel %vm575_vm4, %v1785_v57, %v1791_v51 }
 0x3ba   : > { %v1793_v33 = vsel %vm577_vm5, %v1786_v41, %v1792_v56 }
 0x3bb   : > { %v1787_v2 = vunpack.c.l.b16 %v1963_v35  ;;  %v1788_v20 = vunpack.c.l.b16 %v1964_v12 }
 0x3bd   : > { %v1794_v6 = vsel %vm579_vm6, %v1787_v2, %v1793_v33 }
 0x3be   : > { %v1795_v23 = vsel %vm581_vm7, %v1788_v20, %v1794_v6 }
 0x3bf   : > { %v1796_v30 = vpack.c.b16 %v1795_v23, %v1795_v23 }
 0x3c1   : > { %1929 = vst.msk [vmem:[%s2870_s22 + $0xc] sm:$0xf] %vm254_vm0, %v1796_v30 }
 0x3c2 PF: > { %s12_s11 = sadd.s32 1, %s2151_s11   ;;  %s2970_s9 = smov %s2147_s10 }
 0x3c3   : > { %p9_p5 = scmp.ge.s32.totalorder %s12_s11, 4   ;;  %s2971_s10 = smov %s2973_s12 }
 0x3c5   :  { %11 = sbr.rel (!%p9_p5) target bundleno = 2 (0x2), region = 61 }

</bundles_post_ra>
